<compile_context>
chip_gen: v7x
topology: tpu7x:2x2x1
jax: 0.10.0
libtpu: 0.0.40
codegen_flags: <defaults>
</compile_context>

<pallas_src>
import math
from functools import partial

import jax
import jax.numpy as jnp
from jax.experimental import pallas as pl
from jax.experimental.pallas import tpu as pltpu

EPS = 1e-5
HIDDEN = 128          # hidden width of each Conv1d(1x1) affine network
AFFINE_L_CHUNK = 512  # lane-chunk for the affine-net stage (bounds hidden activations)


def _gelu_exact(x):
    # matches torch.nn.GELU() default (erf formulation)
    # (a tanh-approx GELU would move work from VALU to EUP on v5e, at slight numeric drift)
    return 0.5 * x * (1.0 + jax.lax.erf(x * (1.0 / math.sqrt(2.0))))


def _pick_bt(B):
    """Batch instances per grid step (largest of 8/4/2/1 dividing B)."""
    for bt in (8, 4, 2, 1):
        if B % bt == 0:
            return bt
    return 1


def _pick_chunk(L):
    """Lane chunk for the affine stage: a multiple of 128 dividing L, else the full L."""
    if L <= AFFINE_L_CHUNK:
        return L
    for c in range(AFFINE_L_CHUNK, 0, -128):
        if L % c == 0:
            return c
    return L


# ----------------------------- kernels ------------------------------------- #

def _norm_kernel(x_ref, w1_ref, w2_ref, y_ref, stats_ref, *, Bt, C, chunk, n_chunks):
    H2 = 2 * HIDDEN
    x = x_ref[...]                                      # (Bt, C, L) f32

    # Single-pass statistics over L (lane reduction): mean and E[x^2] together.
    mean = jnp.mean(x, axis=-1, keepdims=True)          # (Bt, C, 1)
    ex2 = jnp.mean(x * x, axis=-1, keepdims=True)
    std = jnp.sqrt(jnp.maximum(ex2 - mean * mean, 0.0))  # unbiased=False
    stats_ref[:, :, 0:1] = mean
    stats_ref[:, :, 1:2] = std

    # Reciprocal on the tiny (Bt, C, 1) tensor -> EUP slot, then a broadcast multiply.
    inv = pl.reciprocal(std + EPS, approx=True)

    # Fused weights (bf16): stage-1 = [w1_gamma; w1_beta], stage-2 = blockdiag(w2_gamma, w2_beta)
    w1 = jnp.broadcast_to(w1_ref[...], (Bt, H2, C))      # (Bt, 2H, C)  bf16
    w2 = jnp.broadcast_to(w2_ref[...], (Bt, 2 * C, H2))  # (Bt, 2C, 2H) bf16

    def affine_combine(xn_c):
        # one MXU matmul + one GELU + one MXU matmul for BOTH affine nets
        h = jnp.einsum('bhc,bcl->bhl', w1, xn_c.astype(jnp.bfloat16),
                       preferred_element_type=jnp.float32)      # (Bt, 2H, Lc)
        h = _gelu_exact(h).astype(jnp.bfloat16)
        gb = jnp.einsum('bph,bhl->bpl', w2, h,
                        preferred_element_type=jnp.float32)     # (Bt, 2C, Lc)
        gamma = gb[:, :C, :]
        beta = gb[:, C:, :]
        return xn_c * gamma + beta

    if n_chunks == 1:
        y_ref[...] = affine_combine((x - mean) * inv)
    else:
        # L-chunked affine stage keeps the (2H, Lc) hidden activations bounded in VMEM.
        def body(ci, carry):
            off = pl.multiple_of(ci * chunk, 128)
            xn_c = (x_ref[:, :, pl.ds(off, chunk)] - mean) * inv
            y_ref[:, :, pl.ds(off, chunk)] = affine_combine(xn_c)
            return carry
        jax.lax.fori_loop(0, n_chunks, body, 0)


def _denorm_kernel(x_ref, mean_ref, std_ref, w1_ref, w2_ref, y_ref,
                   *, Bt, C, chunk, n_chunks):
    H2 = 2 * HIDDEN
    mean = mean_ref[...]                                 # (Bt, C, 1)
    std = std_ref[...]                                   # (Bt, C, 1)
    w1 = jnp.broadcast_to(w1_ref[...], (Bt, H2, C))
    w2 = jnp.broadcast_to(w2_ref[...], (Bt, 2 * C, H2))

    def affine_denorm(xc):
        h = jnp.einsum('bhc,bcl->bhl', w1, xc.astype(jnp.bfloat16),
                       preferred_element_type=jnp.float32)
        h = _gelu_exact(h).astype(jnp.bfloat16)
        gb = jnp.einsum('bph,bhl->bpl', w2, h,
                        preferred_element_type=jnp.float32)
        gamma = gb[:, :C, :]
        beta = gb[:, C:, :]
        return (xc * gamma + beta) * std + mean

    if n_chunks == 1:
        y_ref[...] = affine_denorm(x_ref[...])
    else:
        def body(ci, carry):
            off = pl.multiple_of(ci * chunk, 128)
            y_ref[:, :, pl.ds(off, chunk)] = affine_denorm(x_ref[:, :, pl.ds(off, chunk)])
            return carry
        jax.lax.fori_loop(0, n_chunks, body, 0)


# ----------------------------- wrappers ------------------------------------ #

def _compiler_params():
    # "parallel" batch grid (megacore on v7x when the grid length is >1);
    # raised VMEM limit gives headroom for large (Bt, C, L) I/O blocks on all gens.
    return pltpu.CompilerParams(dimension_semantics=("parallel",),
                                vmem_limit_bytes=48 * 1024 * 1024)


def revin_norm(x_flat, w1f, w2f):
    B, C, L = x_flat.shape
    Bt = _pick_bt(B)
    chunk = _pick_chunk(L)
    n_chunks = L // chunk
    kernel = partial(_norm_kernel, Bt=Bt, C=C, chunk=chunk, n_chunks=n_chunks)
    return pl.pallas_call(
        kernel,
        out_shape=(jax.ShapeDtypeStruct((B, C, L), jnp.float32),
                   jax.ShapeDtypeStruct((B, C, 2), jnp.float32)),
        grid_spec=pltpu.PrefetchScalarGridSpec(
            num_scalar_prefetch=0,
            grid=(B // Bt,),
            in_specs=[pl.BlockSpec((Bt, C, L), lambda b: (b, 0, 0)),
                      pl.BlockSpec((2 * HIDDEN, C), lambda b: (0, 0)),
                      pl.BlockSpec((2 * C, 2 * HIDDEN), lambda b: (0, 0))],
            out_specs=[pl.BlockSpec((Bt, C, L), lambda b: (b, 0, 0)),
                       pl.BlockSpec((Bt, C, 2), lambda b: (b, 0, 0))]),
        compiler_params=_compiler_params(),
    )(x_flat, w1f, w2f)


def revin_denorm(x_flat, mean, stdev, w1f, w2f):
    B, C, L = x_flat.shape
    Bt = _pick_bt(B)
    chunk = _pick_chunk(L)
    n_chunks = L // chunk
    kernel = partial(_denorm_kernel, Bt=Bt, C=C, chunk=chunk, n_chunks=n_chunks)
    return pl.pallas_call(
        kernel,
        out_shape=jax.ShapeDtypeStruct((B, C, L), jnp.float32),
        grid_spec=pltpu.PrefetchScalarGridSpec(
            num_scalar_prefetch=0,
            grid=(B // Bt,),
            in_specs=[pl.BlockSpec((Bt, C, L), lambda b: (b, 0, 0)),
                      pl.BlockSpec((Bt, C, 1), lambda b: (b, 0, 0)),
                      pl.BlockSpec((Bt, C, 1), lambda b: (b, 0, 0)),
                      pl.BlockSpec((2 * HIDDEN, C), lambda b: (0, 0)),
                      pl.BlockSpec((2 * C, 2 * HIDDEN), lambda b: (0, 0))],
            out_specs=pl.BlockSpec((Bt, C, L), lambda b: (b, 0, 0))),
        compiler_params=_compiler_params(),
    )(x_flat, mean, stdev, w1f, w2f)


def _fuse_weights(w1w, w2w, w1b, w2b):
    """Fuse the gamma/beta nets: stage-1 stacked (2H, C), stage-2 block-diagonal (2C, 2H)."""
    c = w1w.shape[1]
    w1f = jnp.concatenate([w1w, w1b], axis=0).astype(jnp.bfloat16)          # (2H, C)
    w2f = jnp.zeros((2 * c, 2 * HIDDEN), jnp.float32)
    w2f = w2f.at[:c, :HIDDEN].set(w2w).at[c:, HIDDEN:].set(w2b)
    return w1f, w2f.astype(jnp.bfloat16)                                    # (2C, 2H)


class RevINPallas:
    """JAX/Pallas port of the PyTorch RevIN module (affine=True)."""

    def __init__(self, num_features, eps=1e-5, affine=True, seed=42):
        assert affine, "affine=False path is trivial; this port implements affine=True"
        assert abs(eps - EPS) < 1e-12, "eps is baked into the kernel as a constant"
        self.num_features = num_features
        self.mean = []
        self.stdev = []
        # Deterministic synthetic weights. Conv1d(out,in,1,bias=False) -> (out,in).
        keys = jax.random.split(jax.random.PRNGKey(seed), 8)
        c = num_features

        def w(k, shape):
            return jax.random.normal(k, shape, jnp.float32) * 0.05

        # unfused f32 weights (kept for the pure-JAX reference)
        self.w_in = (w(keys[0], (HIDDEN, c)), w(keys[1], (c, HIDDEN)),
                     w(keys[2], (HIDDEN, c)), w(keys[3], (c, HIDDEN)))
        self.w_out = (w(keys[4], (HIDDEN, c)), w(keys[5], (c, HIDDEN)),
                      w(keys[6], (HIDDEN, c)), w(keys[7], (c, HIDDEN)))
        # fused bf16 weights for the kernels
        self.wf_in = _fuse_weights(*self.w_in)
        self.wf_out = _fuse_weights(*self.w_out)

    def reinit_stats(self):
        self.mean = []
        self.stdev = []

    def forward(self, x, index, mode: str):
        bs, c = x.shape[0], x.shape[1]
        xf = x.reshape(bs, c, -1).astype(jnp.float32)
        if mode == 'norm':
            y, stats = revin_norm(xf, *self.wf_in)
            self.mean.append(stats[:, :, 0:1])
            self.stdev.append(stats[:, :, 1:2])
            return y.reshape(x.shape)
        elif mode == 'denorm':
            y = revin_denorm(xf, self.mean[index], self.stdev[index], *self.wf_out)
            return y.reshape(x.shape)
        else:
            raise NotImplementedError


# ----------------------------- reference (pure JAX) ------------------------- #

def _mlp_ref(z, w1, w2):
    h = jnp.einsum('oc,bcl->bol', w1, z, precision=jax.lax.Precision.HIGHEST)
    h = _gelu_exact(h)
    return jnp.einsum('co,bol->bcl', w2, h, precision=jax.lax.Precision.HIGHEST)


def revin_norm_ref(x, w_in):
    bs, c = x.shape[0], x.shape[1]
    xf = x.reshape(bs, c, -1)
    mean = jnp.mean(xf, axis=2, keepdims=True)
    std = jnp.sqrt(jnp.mean((xf - mean) ** 2, axis=2, keepdims=True))
    xn = (xf - mean) / (std + EPS)
    gamma = _mlp_ref(xn, w_in[0], w_in[1])
    beta = _mlp_ref(xn, w_in[2], w_in[3])
    return (xn * gamma + beta).reshape(x.shape), mean, std


def revin_denorm_ref(x, mean, std, w_out):
    bs, c = x.shape[0], x.shape[1]
    xf = x.reshape(bs, c, -1)
    gamma = _mlp_ref(xf, w_out[0], w_out[1])
    beta = _mlp_ref(xf, w_out[2], w_out[3])
    y = xf * gamma + beta
    y = y * std + mean
    return y.reshape(x.shape)


# ----------------------------- main ----------------------------------------- #

if __name__ == "__main__":
    key = jax.random.PRNGKey(0)
    B, C, H, W = 2, 4, 16, 16          # x: (batch, num_features, *spatial), L = 256
    x = jax.random.normal(key, (B, C, H, W), jnp.float32)

    revin = RevINPallas(num_features=C, eps=1e-5, affine=True)

    # mode='norm'
    y_norm = revin.forward(x, index=0, mode='norm')
    y_norm = jax.block_until_ready(y_norm)

    # mode='denorm' (uses stored stats at index 0)
    y_denorm = revin.forward(y_norm, index=0, mode='denorm')
    y_denorm = jax.block_until_ready(y_denorm)

    # correctness vs pure-JAX f32 reference (kernel uses bf16 MXU + approx reciprocal)
    y_norm_ref, mean_ref, std_ref = revin_norm_ref(x, revin.w_in)
    y_denorm_ref = revin_denorm_ref(y_norm_ref, mean_ref, std_ref, revin.w_out)

    TOL = 5e-3
    assert jnp.allclose(y_norm, y_norm_ref, rtol=TOL, atol=TOL), "norm mismatch"
    assert jnp.allclose(revin.mean[0], mean_ref, rtol=TOL, atol=TOL), "mean mismatch"
    assert jnp.allclose(revin.stdev[0], std_ref, rtol=TOL, atol=TOL), "stdev mismatch"
    assert jnp.allclose(y_denorm, y_denorm_ref, rtol=TOL, atol=TOL), "denorm mismatch"

    print("KERNEL_OK")
</pallas_src>

<mosaic_0001>
module attributes {stable_mosaic.version = 11 : i64} {
  func.func @_norm_kernel(%arg0: i32, %arg1: memref<2x4x256xf32, #tpu.memory_space<vmem>>, %arg2: memref<256x4xbf16, #tpu.memory_space<vmem>>, %arg3: memref<8x256xbf16, #tpu.memory_space<vmem>>, %arg4: memref<2x4x256xf32, #tpu.memory_space<vmem>>, %arg5: memref<2x4x2xf32, #tpu.memory_space<vmem>>) attributes {dimension_semantics = [#tpu.dimension_semantics<parallel>], iteration_bounds = array<i64: 1>, scalar_prefetch = 0 : i64, scratch_operands = 0 : i64, tpu.core_type = #tpu.core_type<tc>, window_params = [{transform_indices = @transform_0, window_bounds = array<i64: 2, 4, 256>}, {pipeline_mode = #tpu.pipeline_mode<synchronous>, transform_indices = @transform_1, window_bounds = array<i64: 256, 4>}, {pipeline_mode = #tpu.pipeline_mode<synchronous>, transform_indices = @transform_2, window_bounds = array<i64: 8, 256>}, {transform_indices = @transform_3, window_bounds = array<i64: 2, 4, 256>}, {transform_indices = @transform_4, window_bounds = array<i64: 2, 4, 2>}]} {
    %c0 = arith.constant 0 : index
    %c0_0 = arith.constant 0 : index
    %c0_1 = arith.constant 0 : index
    %0 = vector.load %arg1[%c0, %c0_0, %c0_1] : memref<2x4x256xf32, #tpu.memory_space<vmem>>, vector<2x4x256xf32>
    %cst = arith.constant dense<0.000000e+00> : vector<2x4xf32>
    %1 = vector.multi_reduction <add>, %0, %cst [2] : vector<2x4x256xf32> to vector<2x4xf32>
    %2 = vector.shape_cast %1 : vector<2x4xf32> to vector<2x4x1xf32>
    %cst_2 = arith.constant 2.560000e+02 : f32
    %3 = vector.broadcast %cst_2 : f32 to vector<2x4x1xf32>
    %4 = arith.divf %2, %3 : vector<2x4x1xf32>
    %5 = arith.mulf %0, %0 : vector<2x4x256xf32>
    %cst_3 = arith.constant dense<0.000000e+00> : vector<2x4xf32>
    %6 = vector.multi_reduction <add>, %5, %cst_3 [2] : vector<2x4x256xf32> to vector<2x4xf32>
    %7 = vector.shape_cast %6 : vector<2x4xf32> to vector<2x4x1xf32>
    %cst_4 = arith.constant 2.560000e+02 : f32
    %8 = vector.broadcast %cst_4 : f32 to vector<2x4x1xf32>
    %9 = arith.divf %7, %8 : vector<2x4x1xf32>
    %10 = arith.mulf %4, %4 : vector<2x4x1xf32>
    %11 = arith.subf %9, %10 : vector<2x4x1xf32>
    %cst_5 = arith.constant 0.000000e+00 : f32
    %12 = vector.broadcast %cst_5 : f32 to vector<2x4x1xf32>
    %13 = arith.maximumf %11, %12 : vector<2x4x1xf32>
    %14 = math.sqrt %13 : vector<2x4x1xf32>
    %c0_6 = arith.constant 0 : index
    %c0_7 = arith.constant 0 : index
    %c0_8 = arith.constant 0 : index
    %15 = vector.load %arg5[%c0_6, %c0_7, %c0_8] : memref<2x4x2xf32, #tpu.memory_space<vmem>>, vector<2x4x1xf32>
    tpu.vector_store %arg5[%c0_6, %c0_7, %c0_8], %4 {strides = array<i32>} : memref<2x4x2xf32, #tpu.memory_space<vmem>>, vector<2x4x1xf32>,
    %c0_9 = arith.constant 0 : index
    %c0_10 = arith.constant 0 : index
    %c1 = arith.constant 1 : index
    %16 = vector.load %arg5[%c0_9, %c0_10, %c1] : memref<2x4x2xf32, #tpu.memory_space<vmem>>, vector<2x4x1xf32>
    tpu.vector_store %arg5[%c0_9, %c0_10, %c1], %14 {strides = array<i32>} : memref<2x4x2xf32, #tpu.memory_space<vmem>>, vector<2x4x1xf32>,
    %cst_11 = arith.constant 9.99999974E-6 : f32
    %17 = vector.broadcast %cst_11 : f32 to vector<2x4x1xf32>
    %18 = arith.addf %14, %17 : vector<2x4x1xf32>
    %19 = tpu.reciprocal %18 {approx = true} : vector<2x4x1xf32> -> vector<2x4x1xf32>
    %c0_12 = arith.constant 0 : index
    %c0_13 = arith.constant 0 : index
    %20 = vector.load %arg2[%c0_12, %c0_13] : memref<256x4xbf16, #tpu.memory_space<vmem>>, vector<256x4xbf16>
    %21 = vector.shape_cast %20 : vector<256x4xbf16> to vector<1x256x4xbf16>
    %22 = vector.broadcast %21 : vector<1x256x4xbf16> to vector<2x256x4xbf16>
    %c0_14 = arith.constant 0 : index
    %c0_15 = arith.constant 0 : index
    %23 = vector.load %arg3[%c0_14, %c0_15] : memref<8x256xbf16, #tpu.memory_space<vmem>>, vector<8x256xbf16>
    %24 = vector.shape_cast %23 : vector<8x256xbf16> to vector<1x8x256xbf16>
    %25 = vector.broadcast %24 : vector<1x8x256xbf16> to vector<2x8x256xbf16>
    %26 = vector.broadcast %4 : vector<2x4x1xf32> to vector<2x4x256xf32>
    %27 = arith.subf %0, %26 : vector<2x4x256xf32>
    %28 = vector.broadcast %19 : vector<2x4x1xf32> to vector<2x4x256xf32>
    %29 = arith.mulf %27, %28 : vector<2x4x256xf32>
    %30 = arith.truncf %29 : vector<2x4x256xf32> to vector<2x4x256xbf16>
    "tpu.trace_start"() <{level = 10 : i32, message = "bhc,bcl->bhl"}> : () -> ()
    %cst_16 = arith.constant dense<0.000000e+00> : vector<2x256x256xf32>
    %31 = tpu.matmul %22, %30, %cst_16 {dimension_numbers = #tpu.dot_dimension_numbers<[2], [1], [1], [2], [0, 0, 0, 1, 1, 2], [0], [0]>} : vector<2x256x4xbf16>, vector<2x4x256xbf16>, vector<2x256x256xf32> -> vector<2x256x256xf32>
    "tpu.trace_stop"() : () -> ()
    %cst_17 = arith.constant 5.000000e-01 : f32
    %32 = vector.broadcast %cst_17 : f32 to vector<2x256x256xf32>
    %33 = arith.mulf %32, %31 : vector<2x256x256xf32>
    %cst_18 = arith.constant 0.707106769 : f32
    %34 = vector.broadcast %cst_18 : f32 to vector<2x256x256xf32>
    %35 = arith.mulf %31, %34 : vector<2x256x256xf32>
    %36 = math.erf %35 : vector<2x256x256xf32>
    %cst_19 = arith.constant 1.000000e+00 : f32
    %37 = vector.broadcast %cst_19 : f32 to vector<2x256x256xf32>
    %38 = arith.addf %37, %36 : vector<2x256x256xf32>
    %39 = arith.mulf %33, %38 : vector<2x256x256xf32>
    %40 = arith.truncf %39 : vector<2x256x256xf32> to vector<2x256x256xbf16>
    "tpu.trace_start"() <{level = 10 : i32, message = "bph,bhl->bpl"}> : () -> ()
    %cst_20 = arith.constant dense<0.000000e+00> : vector<2x8x256xf32>
    %41 = tpu.matmul %25, %40, %cst_20 {dimension_numbers = #tpu.dot_dimension_numbers<[2], [1], [1], [2], [0, 0, 0, 1, 1, 2], [0], [0]>} : vector<2x8x256xbf16>, vector<2x256x256xbf16>, vector<2x8x256xf32> -> vector<2x8x256xf32>
    "tpu.trace_stop"() : () -> ()
    %42 = vector.extract_strided_slice %41 {offsets = [0, 0, 0], sizes = [2, 4, 256], strides = [1, 1, 1]} : vector<2x8x256xf32> to vector<2x4x256xf32>
    %43 = vector.extract_strided_slice %41 {offsets = [0, 4, 0], sizes = [2, 4, 256], strides = [1, 1, 1]} : vector<2x8x256xf32> to vector<2x4x256xf32>
    %44 = arith.mulf %29, %42 : vector<2x4x256xf32>
    %45 = arith.addf %44, %43 : vector<2x4x256xf32>
    %c0_21 = arith.constant 0 : index
    %c0_22 = arith.constant 0 : index
    %c0_23 = arith.constant 0 : index
    %46 = vector.load %arg4[%c0_21, %c0_22, %c0_23] : memref<2x4x256xf32, #tpu.memory_space<vmem>>, vector<2x4x256xf32>
    tpu.vector_store %arg4[%c0_21, %c0_22, %c0_23], %45 {strides = array<i32>} : memref<2x4x256xf32, #tpu.memory_space<vmem>>, vector<2x4x256xf32>,
    return
  }
  func.func @transform_0(%arg0: i32) -> (i32, i32, i32) {
    %c0_i32 = arith.constant 0 : i32
    %c0_i32_0 = arith.constant 0 : i32
    %c0_i32_1 = arith.constant 0 : i32
    return %arg0, %c0_i32, %c0_i32_0 : i32, i32, i32
  }
  func.func @transform_1(%arg0: i32) -> (i32, i32) {
    %c0_i32 = arith.constant 0 : i32
    %c0_i32_0 = arith.constant 0 : i32
    %c0_i32_1 = arith.constant 0 : i32
    return %c0_i32, %c0_i32_0 : i32, i32
  }
  func.func @transform_2(%arg0: i32) -> (i32, i32) {
    %c0_i32 = arith.constant 0 : i32
    %c0_i32_0 = arith.constant 0 : i32
    %c0_i32_1 = arith.constant 0 : i32
    return %c0_i32, %c0_i32_0 : i32, i32
  }
  func.func @transform_3(%arg0: i32) -> (i32, i32, i32) {
    %c0_i32 = arith.constant 0 : i32
    %c0_i32_0 = arith.constant 0 : i32
    %c0_i32_1 = arith.constant 0 : i32
    return %arg0, %c0_i32, %c0_i32_0 : i32, i32, i32
  }
  func.func @transform_4(%arg0: i32) -> (i32, i32, i32) {
    %c0_i32 = arith.constant 0 : i32
    %c0_i32_0 = arith.constant 0 : i32
    %c0_i32_1 = arith.constant 0 : i32
    return %arg0, %c0_i32, %c0_i32_0 : i32, i32, i32
  }
}

</mosaic_0001>

<bundles_post_ra>
// kernel: tpu_custom_call.1
= control target key start
LH: loop header
LB: loop body
LE: loop exit
PB: predicated region body
PF: predicated region fallthrough
CT: control target
= control target key end

     0   :  { %vm26_vm0 = vcmask 1043456   ;;  %s3080_s0 = inlined_call_operand.vmem [shape: f32[2,4,256], index: 0, kind: input, shape index: {}]   ;;  %s3081_s1 = inlined_call_operand.vmem [shape: bf16[256,4], index: 1, kind: input, shape index: {}]   ;;  %s3082_s2 = inlined_call_operand.vmem [shape: bf16[8,256], index: 2, kind: input, shape index: {}]   ;;  %s3083_s3 = inlined_call_operand.hbm [shape: f32[2,4,256], index: 3, kind: output, shape index: {0}]   ;;  %s3084_s4 = inlined_call_operand.vmem [shape: f32[2,4,2], index: 4, kind: output, shape index: {1}]  }
   0x1   :  { %v1930_v0 = vld [vmem:[%s3080_s0] sm:$0xff]  ;;  %v1935_v1 = vld [vmem:[%s3080_s0 + $0x8] sm:$0xff] }
   0x2   :  { %v22_v2 = vcombine.high %v1930_v0, %v1930_v0  ;;  %v27_v3 = vsel %vm26_vm0, %v1930_v0, 0.0  ;;  %v40_v4 = vmul.f32 %v1930_v0, %v1930_v0  ;;  %v23_v5 = vcombine.high %v1935_v1, %v1935_v1 }
   0x3   :  { %v32_v6 = vsel %vm26_vm0, %v1935_v1, 0.0  ;;  %v41_v7 = vmul.f32 %v1935_v1, %v1935_v1 }
   0x4   :  { %v28_v8 = vsel %vm26_vm0, %v22_v2, 0.0  ;;  %v44_v9 = vcombine.high %v40_v4, %v40_v4  ;;  %v48_v10 = vsel %vm26_vm0, %v40_v4, 0.0  ;;  %v33_v11 = vsel %vm26_vm0, %v23_v5, 0.0 }
   0x5   :  { %v29_v12 = vadd.f32 %v28_v8, %v27_v3  ;;  %v45_v13 = vcombine.high %v41_v7, %v41_v7  ;;  %v53_v15 = vsel %vm26_vm0, %v41_v7, 0.0  ;;  %v34_v17 = vadd.f32 %v33_v11, %v32_v6 }
   0x6   :  { %v49_v14 = vsel %vm26_vm0, %v44_v9, 0.0 }
   0x7   :  { %30 = vadd.xlane.f32.xlu0 %v29_v12  ;;  %v50_v16 = vadd.f32 %v49_v14, %v48_v10  ;;  %v54_v18 = vsel %vm26_vm0, %v45_v13, 0.0 }
   0x8   :  { %v55_v19 = vadd.f32 %v54_v18, %v53_v15 }
   0x9   :  { %51 = vadd.xlane.f32.xlu1 %v50_v16 }
   0xb   :  { %35 = vadd.xlane.f32.xlu0 %v34_v17 }
   0xd   :  { %56 = vadd.xlane.f32.xlu1 %v55_v19 }
   0xe   :  { %10 = vsyncpa [#allocation3], 0  ;;  %v1897_v20 = vmov 0   ;;  %vm80_vm1 = vcmask 3072   ;;  %v128_v36 = vlaneseq  ;;  %v1898_v38 = vmov 839922192  }
   0xf   :  { %341 = vmatprep.mubr.bf16.mxu0 %v1897_v20  ;;  %540 = vmatprep.mubr.bf16.mxu1 %v1897_v20  ;;  %v126_v39 = vunpack.c.l.s4 %v1898_v38  ;;  %vm83_vm3 = vcmask 11272   ;;  %vm302_vm7 = vcmask 1041408   ;;  %v1591_v4 = vld [vmem:[%s3081_s1] sm:$0xff]   ;;  %vm253_vm8 = vcmask 31744   ;;  %v1592_v8 = vld [vmem:[%s3081_s1 + $0x8] sm:$0xff]   ;;  %v1593_v9 = vld [vmem:[%s3081_s1 + $0x10] sm:$0xff]  }
  0x10   :  { %v129_v46 = vshrl.u32 %v128_v36, 7  ;;  %v1594_v10 = vld [vmem:[%s3081_s1 + $0x18] sm:$0xff]   ;;  %v1595_v11 = vld [vmem:[%s3081_s1 + $0x20] sm:$0xff]   ;;  %v1596_v12 = vld [vmem:[%s3081_s1 + $0x28] sm:$0xff]  }
  0x11   :  { %v127_v45 = vunpack.c.0.s8 %v126_v39  ;;  %v1597_v13 = vld [vmem:[%s3081_s1 + $0x30] sm:$0xff]   ;;  %v1598_v14 = vld [vmem:[%s3081_s1 + $0x38] sm:$0xff]   ;;  %v1599_v15 = vld [vmem:[%s3081_s1 + $0x40] sm:$0xff]  }
  0x12   :  { %v1600_v16 = vld [vmem:[%s3081_s1 + $0x48] sm:$0xff]   ;;  %v1601_v17 = vld [vmem:[%s3081_s1 + $0x50] sm:$0xff]   ;;  %v1602_v18 = vld [vmem:[%s3081_s1 + $0x58] sm:$0xff]  }
  0x13   :  { %v130_v51 = vsub.s32 %v127_v45, %v129_v46  ;;  %v1603_v19 = vld [vmem:[%s3081_s1 + $0x60] sm:$0xff]  }
  0x94   :  { %v31_v21 = vpop.xlane.xlu0 %30 }
  0x95   :  { %v38_v22 = vmul.f32 0.00390625, %v31_v21  ;;  %v1604_v21 = vld [vmem:[%s3081_s1 + $0x68] sm:$0xff]  }
  0x96   :  { %v52_v23 = vpop.xlane.xlu1 %51 }
  0x97   :  { %81 = vst.msk [vmem:[%s3084_s4] sm:$0xf] %vm80_vm1, %v38_v22  ;;  %v58_v24 = vmul.f32 0.00390625, %v52_v23  ;;  %v60_v25 = vmul.f32 %v38_v22, %v38_v22  ;;  %v131_v53 = vrot.slane %v38_v22, %v130_v51  ;;  %v1605_v22 = vld [vmem:[%s3081_s1 + $0x70] sm:$0xff]   ;;  %v1606_v23 = vld [vmem:[%s3081_s1 + $0x78] sm:$0xff]  }
  0x98   :  { %v36_v26 = vpop.xlane.xlu0 %35 }
  0x99   :  { %v62_v27 = vsub.f32 %v58_v24, %v60_v25  ;;  %v39_v28 = vmul.f32 0.00390625, %v36_v26  ;;  %v141_v55 = vsub.f32 %v1930_v0, %v131_v53 }
  0x9a   :  { %v57_v29 = vpop.xlane.xlu1 %56 }
  0x9b   :  { %v64_v30 = vmax.f32 %v62_v27, 0.0  ;;  %82 = vst.msk [vmem:[%s3084_s4 + $0x4] sm:$0xf] %vm80_vm1, %v39_v28  ;;  %v59_v31 = vmul.f32 0.00390625, %v57_v29  ;;  %v61_v32 = vmul.f32 %v39_v28, %v39_v28  ;;  %v138_v57 = vrot.slane %v39_v28, %v130_v51 }
  0x9d   :  { %1609 = vrsqrt.f32 %v64_v30  ;;  %v63_v33 = vsub.f32 %v59_v31, %v61_v32  ;;  %vm68_vm2 = vcmp.eq.f32.partialorder %v64_v30, inf  ;;  %v71_v40 = vand.u32 2147483648, %v64_v30 }
  0x9e   :  { %vm70_vm4 = vcmp.eq.f32.partialorder %v64_v30, 0.0  ;;  %v142_v62 = vsub.f32 %v1935_v1, %v138_v57 }
  0x9f   :  { %v65_v34 = vmax.f32 %v63_v33, 0.0 }
  0xa1   :  { %1611 = vrsqrt.f32 %v65_v34  ;;  %vm75_vm5 = vcmp.eq.f32.partialorder %v65_v34, inf  ;;  %v78_v48 = vand.u32 2147483648, %v65_v34  ;;  %vm77_vm6 = vcmp.eq.f32.partialorder %v65_v34, 0.0 }
  0xa7   :  { %v1610_v35 = vpop.eup %1609 }
  0xa8   :  { %v67_v37 = vmul.f32 %v1610_v35, %v64_v30 }
  0xaa   :  { %v69_v41 = vsel %vm68_vm2, %v64_v30, %v67_v37 }
  0xab   :  { %v72_v42 = vsel %vm70_vm4, %v71_v40, %v69_v41  ;;  %v1612_v43 = vpop.eup %1611 }
  0xac   :  { %84 = vst.msk [vmem:[%s3084_s4] sm:$0xf] %vm83_vm3, %v72_v42  ;;  %v86_v44 = vadd.f32 1e-05, %v72_v42  ;;  %v74_v47 = vmul.f32 %v1612_v43, %v65_v34 }
  0xae   :  { %1613 = vrcp.f32 %v86_v44  ;;  %v76_v49 = vsel %vm75_vm5, %v65_v34, %v74_v47 }
  0xaf   :  { %v79_v50 = vsel %vm77_vm6, %v78_v48, %v76_v49 }
  0xb0   :  { %85 = vst.msk [vmem:[%s3084_s4 + $0x4] sm:$0xf] %vm83_vm3, %v79_v50  ;;  %v87_v52 = vadd.f32 1e-05, %v79_v50 }
  0xb2   :  { %1615 = vrcp.f32 %v87_v52 }
  0xb8   :  { %v1614_v54 = vpop.eup %1613 }
  0xb9   :  { %v151_v56 = vrot.slane %v1614_v54, %v130_v51 }
  0xbb   :  { %v1972_v58 = vmul.f32 %v151_v56, %v141_v55 }
  0xbc   :  { %v1616_v59 = vpop.eup %1615 }
  0xbd   :  { %3098 = vst [vmem:[#allocation5_spill] sm:$0xff] %v1972_v58  ;;  %v165_v60 = vcombine.high %v1972_v58, %v1972_v58  ;;  %v169_v61 = vpack.c.bf16 %v1972_v58, %v1972_v58  ;;  %v158_v63 = vrot.slane %v1616_v59, %v130_v51 }
  0xbf   :  { %v170_v2 = vpack.c.bf16 %v165_v60, %v165_v60  ;;  %v1979_v3 = vmul.f32 %v158_v63, %v142_v62  ;;  %v304_v0 = vsel %vm302_vm7, %v169_v61, 0 }
  0xc1   :  { %3099 = vst [vmem:[#allocation6_spill] sm:$0xff] %v1979_v3  ;;  %1548 = vmatprep.subr.msk.bf16.mxu0 %vm302_vm7, %v170_v2  ;;  %v166_v5 = vcombine.high %v1979_v3, %v1979_v3  ;;  %v171_v6 = vpack.c.bf16 %v1979_v3, %v1979_v3 }
  0xc2   :  { %310 = vmatpush1.bf16.msra.mxu0 %v304_v0 }
  0xc3   :  { %v172_v1 = vpack.c.bf16 %v166_v5, %v166_v5  ;;  %v503_v7 = vsel %vm302_vm7, %v171_v6, 0 }
  0xc5   :  { %1549 = vmatmul.mubr.msk.bf16.vlgmr.msra.gmra.mrb[0].mxu0 %vm253_vm8, %v1591_v4  ;;  %1565 = vmatprep.subr.msk.bf16.mxu1 %vm302_vm7, %v172_v1 }
  0xc6   :  { %351 = vmatprep.mubr.bf16.mxu0 %v1897_v20  ;;  %509 = vmatpush1.bf16.msra.mxu1 %v503_v7 }
  0xc9   :  { %1566 = vmatmul.mubr.msk.bf16.vlgmr.msra.gmra.mrb[0].mxu1 %vm253_vm8, %v1591_v4 }
  0xca   :  { %550 = vmatprep.mubr.bf16.mxu1 %v1897_v20 }
  0xcd   :  { %1550 = vmatmul.mubr.msk.bf16.gmra.mrb[4].mxu0 %vm253_vm8, %v1592_v8 }
  0xce   :  { %361 = vmatprep.mubr.bf16.mxu0 %v1897_v20 }
  0xd1   :  { %1567 = vmatmul.mubr.msk.bf16.gmra.mrb[4].mxu1 %vm253_vm8, %v1592_v8 }
  0xd2   :  { %560 = vmatprep.mubr.bf16.mxu1 %v1897_v20 }
  0xd5   :  { %1551 = vmatmul.mubr.msk.bf16.gmra.mrb[8].mxu0 %vm253_vm8, %v1593_v9 }
  0xd6   :  { %371 = vmatprep.mubr.bf16.mxu0 %v1897_v20 }
  0xd9   :  { %1568 = vmatmul.mubr.msk.bf16.gmra.mrb[8].mxu1 %vm253_vm8, %v1593_v9 }
  0xda   :  { %570 = vmatprep.mubr.bf16.mxu1 %v1897_v20 }
  0xdd   :  { %1552 = vmatmul.mubr.msk.bf16.gmra.mrb[12].mxu0 %vm253_vm8, %v1594_v10 }
  0xde   :  { %381 = vmatprep.mubr.bf16.mxu0 %v1897_v20 }
  0xe1   :  { %1569 = vmatmul.mubr.msk.bf16.gmra.mrb[12].mxu1 %vm253_vm8, %v1594_v10 }
  0xe2   :  { %580 = vmatprep.mubr.bf16.mxu1 %v1897_v20 }
  0xe5   :  { %1553 = vmatmul.mubr.msk.bf16.gmra.mrb[16].mxu0 %vm253_vm8, %v1595_v11 }
  0xe6   :  { %391 = vmatprep.mubr.bf16.mxu0 %v1897_v20 }
  0xe9   :  { %1570 = vmatmul.mubr.msk.bf16.gmra.mrb[16].mxu1 %vm253_vm8, %v1595_v11 }
  0xea   :  { %590 = vmatprep.mubr.bf16.mxu1 %v1897_v20 }
  0xed   :  { %1554 = vmatmul.mubr.msk.bf16.gmra.mrb[20].mxu0 %vm253_vm8, %v1596_v12 }
  0xee   :  { %401 = vmatprep.mubr.bf16.mxu0 %v1897_v20 }
  0xf1   :  { %1571 = vmatmul.mubr.msk.bf16.gmra.mrb[20].mxu1 %vm253_vm8, %v1596_v12 }
  0xf2   :  { %600 = vmatprep.mubr.bf16.mxu1 %v1897_v20 }
  0xf5   :  { %1555 = vmatmul.mubr.msk.bf16.gmra.mrb[24].mxu0 %vm253_vm8, %v1597_v13 }
  0xf6   :  { %411 = vmatprep.mubr.bf16.mxu0 %v1897_v20 }
  0xf9   :  { %1572 = vmatmul.mubr.msk.bf16.gmra.mrb[24].mxu1 %vm253_vm8, %v1597_v13 }
  0xfa   :  { %610 = vmatprep.mubr.bf16.mxu1 %v1897_v20 }
  0xfd   :  { %1556 = vmatmul.mubr.msk.bf16.gmra.mrb[28].mxu0 %vm253_vm8, %v1598_v14 }
  0xfe   :  { %421 = vmatprep.mubr.bf16.mxu0 %v1897_v20 }
 0x101   :  { %1573 = vmatmul.mubr.msk.bf16.gmra.mrb[28].mxu1 %vm253_vm8, %v1598_v14 }
 0x102   :  { %620 = vmatprep.mubr.bf16.mxu1 %v1897_v20 }
 0x105   :  { %1557 = vmatmul.mubr.msk.bf16.gmra.mrb[32].mxu0 %vm253_vm8, %v1599_v15 }
 0x106   :  { %431 = vmatprep.mubr.bf16.mxu0 %v1897_v20 }
 0x109   :  { %1574 = vmatmul.mubr.msk.bf16.gmra.mrb[32].mxu1 %vm253_vm8, %v1599_v15 }
 0x10a   :  { %630 = vmatprep.mubr.bf16.mxu1 %v1897_v20 }
 0x10d   :  { %1558 = vmatmul.mubr.msk.bf16.gmra.mrb[36].mxu0 %vm253_vm8, %v1600_v16 }
 0x10e   :  { %441 = vmatprep.mubr.bf16.mxu0 %v1897_v20 }
 0x111   :  { %1575 = vmatmul.mubr.msk.bf16.gmra.mrb[36].mxu1 %vm253_vm8, %v1600_v16 }
 0x112   :  { %640 = vmatprep.mubr.bf16.mxu1 %v1897_v20 }
 0x115   :  { %1559 = vmatmul.mubr.msk.bf16.gmra.mrb[40].mxu0 %vm253_vm8, %v1601_v17 }
 0x116   :  { %451 = vmatprep.mubr.bf16.mxu0 %v1897_v20 }
 0x119   :  { %1576 = vmatmul.mubr.msk.bf16.gmra.mrb[40].mxu1 %vm253_vm8, %v1601_v17 }
 0x11a   :  { %650 = vmatprep.mubr.bf16.mxu1 %v1897_v20 }
 0x11d   :  { %1560 = vmatmul.mubr.msk.bf16.gmra.mrb[44].mxu0 %vm253_vm8, %v1602_v18 }
 0x11e   :  { %461 = vmatprep.mubr.bf16.mxu0 %v1897_v20 }
 0x121   :  { %1577 = vmatmul.mubr.msk.bf16.gmra.mrb[44].mxu1 %vm253_vm8, %v1602_v18 }
 0x122   :  { %660 = vmatprep.mubr.bf16.mxu1 %v1897_v20 }
 0x125   :  { %1561 = vmatmul.mubr.msk.bf16.gmra.mrb[48].mxu0 %vm253_vm8, %v1603_v19 }
 0x126   :  { %471 = vmatprep.mubr.bf16.mxu0 %v1897_v20 }
 0x129   :  { %1578 = vmatmul.mubr.msk.bf16.gmra.mrb[48].mxu1 %vm253_vm8, %v1603_v19 }
 0x12a   :  { %670 = vmatprep.mubr.bf16.mxu1 %v1897_v20 }
 0x12d   :  { %1562 = vmatmul.mubr.msk.bf16.gmra.mrb[52].mxu0 %vm253_vm8, %v1604_v21 }
 0x12e   :  { %481 = vmatprep.mubr.bf16.mxu0 %v1897_v20 }
 0x131   :  { %1579 = vmatmul.mubr.msk.bf16.gmra.mrb[52].mxu1 %vm253_vm8, %v1604_v21 }
 0x132   :  { %680 = vmatprep.mubr.bf16.mxu1 %v1897_v20 }
 0x135   :  { %1563 = vmatmul.mubr.msk.bf16.gmra.mrb[56].mxu0 %vm253_vm8, %v1605_v22 }
 0x136   :  { %491 = vmatprep.mubr.bf16.mxu0 %v1897_v20 }
 0x139   :  { %1580 = vmatmul.mubr.msk.bf16.gmra.mrb[56].mxu1 %vm253_vm8, %v1605_v22 }
 0x13a   :  { %690 = vmatprep.mubr.bf16.mxu1 %v1897_v20 }
 0x13d   :  { %1564 = vmatmul.mubr.msk.bf16.gmra.mrb[60].mxu0 %vm253_vm8, %v1606_v23 }
 0x141   :  { %1581 = vmatmul.mubr.msk.bf16.gmra.mrb[60].mxu1 %vm253_vm8, %v1606_v23 }
 0x198   :  { %v343_v24 = vpop.f32.mrb[0].mxu0 }
 0x199   :  { %v829_v25 = vmul.f32 0.70710677, %v343_v24  ;;  %v345_v26 = vpop.f32.mrb[1].mxu0  ;;  %v701_v46 = vmul.f32 0.5, %v343_v24 }
 0x19a   :  { %v830_v27 = vmul.f32 0.70710677, %v345_v26  ;;  %v347_v28 = vpop.f32.mrb[2].mxu0  ;;  %v702_v48 = vmul.f32 0.5, %v345_v26 }
 0x19b   :  { %1617 = verf.f32 %v829_v25  ;;  %v831_v29 = vmul.f32 0.70710677, %v347_v28  ;;  %v349_v30 = vpop.f32.mrb[3].mxu0  ;;  %v703_v49 = vmul.f32 0.5, %v347_v28 }
 0x19c   :  { %v832_v31 = vmul.f32 0.70710677, %v349_v30  ;;  %v542_v32 = vpop.f32.mrb[0].mxu1  ;;  %v2095_v53 = vmul.f32 0.5, %v349_v30 }
 0x19d   :  { %1619 = verf.f32 %v831_v29  ;;  %v893_v33 = vmul.f32 0.70710677, %v542_v32  ;;  %v544_v34 = vpop.f32.mrb[1].mxu1  ;;  %v765_v57 = vmul.f32 0.5, %v542_v32 }
 0x19e   :  { %1621 = verf.f32 %v830_v27  ;;  %v894_v35 = vmul.f32 0.70710677, %v544_v34  ;;  %v546_v20 = vpop.f32.mrb[2].mxu1  ;;  %v2097_v59 = vmul.f32 0.5, %v544_v34 }
 0x19f   :  { %1623 = verf.f32 %v893_v33  ;;  %v895_v36 = vmul.f32 0.70710677, %v546_v20  ;;  %v548_v37 = vpop.f32.mrb[3].mxu1  ;;  %v767_v2 = vmul.f32 0.5, %v546_v20 }
 0x1a0   :  { %v353_v38 = vpop.f32.mrb[4].mxu0  ;;  %1625 = verf.f32 %v832_v31  ;;  %v896_v39 = vmul.f32 0.70710677, %v548_v37  ;;  %v2099_v0 = vmul.f32 0.5, %v548_v37 }
 0x1a1   :  { %v355_v40 = vpop.f32.mrb[5].mxu0  ;;  %1627 = verf.f32 %v895_v36  ;;  %v833_v41 = vmul.f32 0.70710677, %v353_v38  ;;  %v705_v6 = vmul.f32 0.5, %v353_v38 }
 0x1a2   :  { %v357_v42 = vpop.f32.mrb[6].mxu0  ;;  %1629 = verf.f32 %v894_v35  ;;  %v834_v43 = vmul.f32 0.70710677, %v355_v40  ;;  %v2101_v1 = vmul.f32 0.5, %v355_v40 }
 0x1a3   :  { %v835_v44 = vmul.f32 0.70710677, %v357_v42  ;;  %v359_v45 = vpop.f32.mrb[7].mxu0  ;;  %1631 = verf.f32 %v833_v41  ;;  %v707_v22 = vmul.f32 0.5, %v357_v42 }
 0x1a4   :  { %1633 = verf.f32 %v896_v39  ;;  %v836_v50 = vmul.f32 0.70710677, %v359_v45  ;;  %v552_v51 = vpop.f32.mrb[4].mxu1  ;;  %v2109_v23 = vmul.f32 0.5, %v359_v45 }
 0x1a5   :  { %v1618_v47 = vpop.eup %1617  ;;  %1635 = verf.f32 %v835_v44  ;;  %v897_v54 = vmul.f32 0.70710677, %v552_v51  ;;  %v554_v55 = vpop.f32.mrb[5].mxu1  ;;  %v2111_v26 = vmul.f32 0.5, %v552_v51 }
 0x1a6   :  { %v1085_v52 = vadd.f32 1.0, %v1618_v47  ;;  %1637 = verf.f32 %v834_v43  ;;  %v898_v60 = vmul.f32 0.70710677, %v554_v55  ;;  %v556_v61 = vpop.f32.mrb[6].mxu1  ;;  %v2113_v31 = vmul.f32 0.5, %v554_v55 }
 0x1a7   :  { %v1620_v56 = vpop.eup %1619  ;;  %1639 = verf.f32 %v897_v54  ;;  %v558_v4 = vpop.f32.mrb[7].mxu1  ;;  %v899_v7 = vmul.f32 0.70710677, %v556_v61  ;;  %v771_v32 = vmul.f32 0.5, %v556_v61 }
 0x1a8   :  { %v1622_v62 = vpop.eup %1621  ;;  %v1087_v63 = vadd.f32 1.0, %v1620_v56  ;;  %v363_v5 = vpop.f32.mrb[8].mxu0  ;;  %1641 = verf.f32 %v836_v50  ;;  %v2103_v10 = vmul.f32 %v1085_v52, %v701_v46  ;;  %v900_v12 = vmul.f32 0.70710677, %v558_v4 }
 0x1a9   :  { %v365_v8 = vpop.f32.mrb[9].mxu0  ;;  %v1624_v9 = vpop.eup %1623  ;;  %1643 = verf.f32 %v898_v60  ;;  %v1086_v15 = vadd.f32 1.0, %v1622_v62  ;;  %v837_v17 = vmul.f32 0.70710677, %v363_v5  ;;  %v2123_v42 = vmul.f32 0.5, %v558_v4 }
 0x1aa   :  { %v2105_v11 = vmul.f32 %v1087_v63, %v703_v49  ;;  %v367_v13 = vpop.f32.mrb[10].mxu0  ;;  %v1626_v14 = vpop.eup %1625  ;;  %v1149_v16 = vadd.f32 1.0, %v1624_v9  ;;  %1645 = verf.f32 %v899_v7  ;;  %v838_v27 = vmul.f32 0.70710677, %v365_v8 }
 0x1ab   :  { %v369_v18 = vpop.f32.mrb[11].mxu0  ;;  %v1628_v19 = vpop.eup %1627  ;;  %1647 = verf.f32 %v900_v12  ;;  %v1088_v30 = vadd.f32 1.0, %v1626_v14  ;;  %v839_v33 = vmul.f32 0.70710677, %v367_v13  ;;  %v1214_v20 = vmul.f32 %v1086_v15, %v702_v48 }
 0x1ac   :  { %v1341_v21 = vpack.c.bf16 %v2105_v11, %v2103_v10  ;;  %v1630_v24 = vpop.eup %1629  ;;  %v1151_v25 = vadd.f32 1.0, %v1628_v19  ;;  %1649 = verf.f32 %v837_v17  ;;  %v562_v28 = vpop.f32.mrb[8].mxu1  ;;  %v2117_v36 = vmul.f32 %v1149_v16, %v765_v57 }
 0x1ad   :  { %v1632_v29 = vpop.eup %1631  ;;  %v2115_v34 = vpop.f32.mrb[9].mxu1  ;;  %v1150_v41 = vadd.f32 1.0, %v1630_v24  ;;  %1651 = verf.f32 %v839_v33  ;;  %v840_v43 = vmul.f32 0.70710677, %v369_v18  ;;  %v2131_v49 = vmul.f32 0.5, %v363_v5 }
 0x1ae   :  { %v1634_v35 = vpop.eup %1633  ;;  %v2119_v37 = vmul.f32 %v1151_v25, %v767_v2  ;;  %v1089_v38 = vadd.f32 1.0, %v1632_v29  ;;  %v2121_v39 = vpop.f32.mrb[10].mxu1  ;;  %1653 = verf.f32 %v838_v27  ;;  %v1216_v52 = vmul.f32 %v1088_v30, %v2095_v53 }
 0x1af   :  { %v1636_v40 = vpop.eup %1635  ;;  %v2125_v44 = vpop.f32.mrb[11].mxu1  ;;  %v1152_v54 = vadd.f32 1.0, %v1634_v35  ;;  %v2136_v55 = vmul.f32 0.5, %v365_v8  ;;  %v901_v56 = vmul.f32 0.70710677, %v562_v28  ;;  %1655 = verf.f32 %v840_v43 }
 0x1b0   :  { %v2127_v45 = vpop.f32.mrb[12].mxu0  ;;  %v1638_v46 = vpop.eup %1637  ;;  %v1373_v47 = vpack.c.bf16 %v2119_v37, %v2117_v36  ;;  %v1091_v48 = vadd.f32 1.0, %v1636_v40  ;;  %v2140_v61 = vmul.f32 %v1089_v38, %v705_v6  ;;  %v902_v63 = vmul.f32 0.70710677, %v2115_v34 }
 0x1b1   :  { %v2133_v50 = vpop.f32.mrb[13].mxu0  ;;  %v1640_v51 = vpop.eup %1639  ;;  %v1278_v5 = vmul.f32 %v1150_v41, %v2097_v59  ;;  %v711_v7 = vmul.f32 0.5, %v367_v13  ;;  %1657 = verf.f32 %v901_v56  ;;  %v1090_v9 = vadd.f32 1.0, %v1638_v46 }
 0x1b2   :  { %v2138_v57 = vpop.f32.mrb[14].mxu0  ;;  %v1642_v60 = vpop.eup %1641  ;;  %v2142_v62 = vmul.f32 %v1091_v48, %v707_v22  ;;  %v1153_v53 = vadd.f32 1.0, %v1640_v51  ;;  %v2150_v6 = vmul.f32 0.5, %v369_v18  ;;  %v903_v14 = vmul.f32 0.70710677, %v2121_v39 }
 0x1b3   :  { %v2145_v2 = vpop.f32.mrb[15].mxu0  ;;  %v1644_v4 = vpop.eup %1643  ;;  %v1280_v17 = vmul.f32 %v1152_v54, %v2099_v0  ;;  %1659 = verf.f32 %v902_v63  ;;  %v904_v59 = vmul.f32 0.70710677, %v2125_v44  ;;  %v1092_v24 = vadd.f32 1.0, %v1642_v60 }
 0x1b4   :  { %v1646_v8 = vpop.eup %1645  ;;  %v1343_v12 = vpack.c.bf16 %v2142_v62, %v2140_v61  ;;  %v2153_v15 = vpop.f32.mrb[12].mxu1  ;;  %v2159_v25 = vmul.f32 0.5, %v562_v28  ;;  %1661 = verf.f32 %v903_v14  ;;  %v1342_v18 = vpack.c.bf16 %v1216_v52, %v1214_v20 }
 0x1b5   :  { %v1648_v16 = vpop.eup %1647  ;;  %v1155_v19 = vadd.f32 1.0, %v1646_v8  ;;  %v2157_v13 = vpop.f32.mrb[13].mxu1  ;;  %v2164_v29 = vmul.f32 %v1153_v53, %v2111_v26  ;;  %v1154_v30 = vadd.f32 1.0, %v1644_v4  ;;  %v841_v0 = vmul.f32 0.70710677, %v2127_v45 }
 0x1b6   :  { %v1650_v22 = vpop.eup %1649  ;;  %v2161_v27 = vpop.f32.mrb[14].mxu1  ;;  %v2174_v40 = vmul.f32 %v1090_v9, %v2101_v1  ;;  %1663 = verf.f32 %v904_v59  ;;  %1412 = vmatprep.subr.bf16.mxu0 %v1342_v18  ;;  %v842_v20 = vmul.f32 0.70710677, %v2133_v50  ;;  %v1156_v43 = vadd.f32 1.0, %v1648_v16 }
 0x1b7   :  { %v2166_v33 = vmul.f32 %v1155_v19, %v771_v32  ;;  %v2169_v35 = vpop.f32.mrb[15].mxu1  ;;  %v1093_v28 = vadd.f32 1.0, %v1650_v22  ;;  %v1652_v26 = vpop.eup %1651  ;;  %v2182_v46 = vmul.f32 0.5, %v2115_v34  ;;  %1665 = verf.f32 %v841_v0  ;;  %1413 = vmatpush1.bf16.msra.mxu0 %v1341_v21 }
 0x1b8   :  { %v2171_v38 = vpop.f32.mrb[16].mxu0  ;;  %v1654_v48 = vpop.eup %1653  ;;  %v1220_v51 = vmul.f32 %v1092_v24, %v2109_v23  ;;  %v1095_v52 = vadd.f32 1.0, %v1652_v26  ;;  %v775_v54 = vmul.f32 0.5, %v2121_v39  ;;  %v843_v56 = vmul.f32 0.70710677, %v2138_v57 }
 0x1b9   :  { %v2177_v41 = vpop.f32.mrb[17].mxu0  ;;  %v1375_v32 = vpack.c.bf16 %v2166_v33, %v2164_v29  ;;  %v2195_v34 = vmul.f32 %v1154_v30, %v2113_v31  ;;  %1667 = verf.f32 %v842_v20  ;;  %v844_v63 = vmul.f32 0.70710677, %v2145_v2  ;;  %v1656_v11 = vpop.eup %1655 }
 0x1ba   :  { %v2187_v1 = vpop.f32.mrb[18].mxu0  ;;  %v1374_v10 = vpack.c.bf16 %v1280_v17, %v1278_v5  ;;  %v2199_v21 = vmul.f32 %v1093_v28, %v2131_v49  ;;  %v2201_v4 = vmul.f32 %v1095_v52, %v711_v7  ;;  %1669 = verf.f32 %v843_v56 }
 0x1bb   :  { %v2192_v60 = vpop.f32.mrb[19].mxu0  ;;  %v905_v23 = vmul.f32 0.70710677, %v2153_v15  ;;  %v1658_v53 = vpop.eup %1657  ;;  %v2207_v8 = vmul.f32 %v1156_v43, %v2123_v42  ;;  %v1094_v31 = vadd.f32 1.0, %v1654_v48  ;;  %v2210_v9 = vmul.f32 0.5, %v2125_v44 }
 0x1bc   :  { %v2204_v39 = vpop.f32.mrb[16].mxu1  ;;  %v2213_v5 = vmul.f32 0.5, %v2127_v45  ;;  %1453 = vmatprep.subr.bf16.mxu1 %v1374_v10  ;;  %v1345_v7 = vpack.c.bf16 %v2201_v4, %v2199_v21  ;;  %v2220_v14 = vmul.f32 0.5, %v2133_v50  ;;  %v906_v42 = vmul.f32 0.70710677, %v2157_v13 }
 0x1bd   :  { %v2215_v49 = vpop.f32.mrb[17].mxu1  ;;  %1671 = verf.f32 %v905_v23  ;;  %1454 = vmatpush1.bf16.msra.mxu1 %v1373_v47  ;;  %v1660_v45 = vpop.eup %1659  ;;  %v1157_v16 = vadd.f32 1.0, %v1658_v53  ;;  %v715_v17 = vmul.f32 0.5, %v2138_v57  ;;  %v907_v19 = vmul.f32 0.70710677, %v2161_v27 }
 0x1be   :  { %v2226_v44 = vpop.f32.mrb[18].mxu1  ;;  %1673 = verf.f32 %v844_v63  ;;  %v1662_v22 = vpop.eup %1661  ;;  %v1096_v24 = vadd.f32 1.0, %v1656_v11  ;;  %v2235_v36 = vmul.f32 0.5, %v2145_v2  ;;  %v908_v37 = vmul.f32 0.70710677, %v2169_v35 }
 0x1bf   :  { %v2230_v59 = vpop.f32.mrb[19].mxu1  ;;  %v1344_v47 = vpack.c.bf16 %v1220_v51, %v2174_v40  ;;  %v2242_v57 = vmul.f32 %v1094_v31, %v2136_v55  ;;  %v1159_v30 = vadd.f32 1.0, %v1662_v22  ;;  %1675 = verf.f32 %v907_v19 }
 0x1c0   :  { %v2232_v50 = vpop.f32.mrb[20].mxu0  ;;  %v845_v0 = vmul.f32 0.70710677, %v2171_v38  ;;  %v1664_v20 = vpop.eup %1663  ;;  %v1158_v26 = vadd.f32 1.0, %v1660_v45  ;;  %v2248_v2 = vmul.f32 0.5, %v2153_v15  ;;  %1677 = verf.f32 %v906_v42 }
 0x1c1   :  { %v2239_v18 = vpop.f32.mrb[21].mxu0  ;;  %1414 = vmatprep.subr.bf16.mxu0 %v1344_v47  ;;  %v846_v40 = vmul.f32 0.70710677, %v2177_v41  ;;  %v1666_v48 = vpop.eup %1665  ;;  %v2254_v55 = vmul.f32 %v1157_v16, %v2159_v25  ;;  %v2256_v51 = vmul.f32 %v1159_v30, %v775_v54  ;;  %v847_v15 = vmul.f32 0.70710677, %v2187_v1 }
 0x1c2   :  { %v2245_v28 = vpop.f32.mrb[22].mxu0  ;;  %1679 = verf.f32 %v845_v0  ;;  %1415 = vmatpush1.bf16.msra.mxu0 %v1343_v12  ;;  %v1224_v52 = vmul.f32 %v1096_v24, %v2150_v6  ;;  %v2264_v56 = vmul.f32 0.5, %v2157_v13  ;;  %v779_v63 = vmul.f32 0.5, %v2161_v27 }
 0x1c3   :  { %v2251_v43 = vpop.f32.mrb[23].mxu0  ;;  %1681 = verf.f32 %v908_v37  ;;  %v1668_v25 = vpop.eup %1667  ;;  %v1377_v54 = vpack.c.bf16 %v2256_v51, %v2254_v55  ;;  %v1160_v11 = vadd.f32 1.0, %v1664_v20  ;;  %v1097_v23 = vadd.f32 1.0, %v1666_v48 }
 0x1c4   :  { %v2267_v10 = vpop.f32.mrb[20].mxu1  ;;  %1683 = verf.f32 %v847_v15  ;;  %v1670_v62 = vpop.eup %1669  ;;  %v848_v12 = vmul.f32 0.70710677, %v2192_v60  ;;  %v1376_v6 = vpack.c.bf16 %v2207_v8, %v2195_v34  ;;  %v909_v13 = vmul.f32 0.70710677, %v2204_v39 }
 0x1c5   :  { %v2271_v61 = vpop.f32.mrb[21].mxu1  ;;  %1685 = verf.f32 %v846_v40  ;;  %v2280_v53 = vmul.f32 %v1158_v26, %v2182_v46  ;;  %v1099_v31 = vadd.f32 1.0, %v1670_v62  ;;  %v2283_v42 = vmul.f32 0.5, %v2169_v35 }
 0x1c6   :  { %v2277_v27 = vpop.f32.mrb[22].mxu1  ;;  %v2286_v45 = vmul.f32 0.5, %v2171_v38  ;;  %v1098_v34 = vadd.f32 1.0, %v1668_v25  ;;  %v2293_v8 = vmul.f32 0.5, %v2177_v41  ;;  %1455 = vmatprep.subr.bf16.mxu1 %v1376_v6  ;;  %1687 = verf.f32 %v909_v13 }
 0x1c7   :  { %v2288_v16 = vpop.f32.mrb[23].mxu1  ;;  %v1672_v22 = vpop.eup %1671  ;;  %v910_v46 = vmul.f32 0.70710677, %v2215_v49  ;;  %v2299_v37 = vmul.f32 %v1097_v23, %v2213_v5  ;;  %v2301_v38 = vmul.f32 %v1099_v31, %v715_v17  ;;  %1456 = vmatpush1.bf16.msra.mxu1 %v1375_v32  ;;  %v911_v41 = vmul.f32 0.70710677, %v2226_v44 }
 0x1c8   :  { %v2290_v19 = vpop.f32.mrb[24].mxu0  ;;  %v1674_v35 = vpop.eup %1673  ;;  %v1161_v47 = vadd.f32 1.0, %v1672_v22  ;;  %v1288_v0 = vmul.f32 %v1160_v11, %v2210_v9  ;;  %v719_v20 = vmul.f32 0.5, %v2187_v1  ;;  %1689 = verf.f32 %v848_v12 }
 0x1c9   :  { %v2296_v24 = vpop.f32.mrb[25].mxu0  ;;  %v912_v26 = vmul.f32 0.70710677, %v2230_v59  ;;  %v1676_v17 = vpop.eup %1675  ;;  %v1347_v40 = vpack.c.bf16 %v2301_v38, %v2299_v37  ;;  %v2317_v29 = vmul.f32 0.5, %v2192_v60  ;;  %1691 = verf.f32 %v911_v41 }
 0x1ca   :  { %v2307_v30 = vpop.f32.mrb[26].mxu0  ;;  %v1346_v33 = vpack.c.bf16 %v1224_v52, %v2242_v57  ;;  %v1678_v32 = vpop.eup %1677  ;;  %v1100_v48 = vadd.f32 1.0, %v1674_v35  ;;  %v1163_v9 = vadd.f32 1.0, %v1676_v17  ;;  %v2321_v1 = vmul.f32 0.5, %v2204_v39 }
 0x1cb   :  { %v2312_v5 = vpop.f32.mrb[27].mxu0  ;;  %1693 = verf.f32 %v910_v46  ;;  %v2326_v11 = vmul.f32 %v1098_v34, %v2220_v14  ;;  %v2329_v23 = vmul.f32 %v1161_v47, %v2248_v2  ;;  %v849_v60 = vmul.f32 0.70710677, %v2232_v50 }
 0x1cc   :  { %v2323_v15 = vpop.f32.mrb[24].mxu1  ;;  %v1680_v25 = vpop.eup %1679  ;;  %1695 = verf.f32 %v912_v26  ;;  %1416 = vmatprep.subr.bf16.mxu0 %v1346_v33  ;;  %v2332_v52 = vmul.f32 %v1163_v9, %v779_v63  ;;  %v850_v39 = vmul.f32 0.70710677, %v2239_v18  ;;  %v851_v14 = vmul.f32 0.70710677, %v2245_v28 }
 0x1cd   :  { %v1682_v57 = vpop.eup %1681  ;;  %v1101_v62 = vadd.f32 1.0, %v1680_v25  ;;  %1417 = vmatpush1.bf16.msra.mxu0 %v1345_v7  ;;  %v2339_v12 = vpop.f32.mrb[25].mxu1  ;;  %v1162_v6 = vadd.f32 1.0, %v1678_v32  ;;  %v2342_v13 = vmul.f32 0.5, %v2215_v49  ;;  %v783_v31 = vmul.f32 0.5, %v2226_v44 }
 0x1ce   :  { %v1684_v2 = vpop.eup %1683  ;;  %1697 = verf.f32 %v849_v60  ;;  %v2345_v63 = vpop.f32.mrb[26].mxu1  ;;  %v1228_v4 = vmul.f32 %v1100_v48, %v2235_v36  ;;  %v1379_v7 = vpack.c.bf16 %v2332_v52, %v2329_v23  ;;  %v2353_v46 = vmul.f32 0.5, %v2230_v59 }
 0x1cf   :  { %v1686_v21 = vpop.eup %1685  ;;  %v1103_v34 = vadd.f32 1.0, %v1684_v2  ;;  %v2355_v35 = vpop.f32.mrb[27].mxu1  ;;  %v1164_v44 = vadd.f32 1.0, %v1682_v57  ;;  %1699 = verf.f32 %v851_v14  ;;  %v852_v47 = vmul.f32 0.70710677, %v2251_v43 }
 0x1d0   :  { %v2347_v22 = vpop.f32.mrb[28].mxu0  ;;  %v1378_v41 = vpack.c.bf16 %v1288_v0, %v2280_v53  ;;  %v1688_v36 = vpop.eup %1687  ;;  %v2364_v17 = vmul.f32 %v1101_v62, %v2286_v45  ;;  %1701 = verf.f32 %v850_v39  ;;  %v913_v59 = vmul.f32 0.70710677, %v2267_v10 }
 0x1d1   :  { %v2357_v49 = vpop.f32.mrb[29].mxu0  ;;  %v2366_v33 = vmul.f32 %v1103_v34, %v719_v20  ;;  %v2372_v48 = vmul.f32 %v1162_v6, %v2264_v56  ;;  %v1102_v9 = vadd.f32 1.0, %v1686_v21  ;;  %v2375_v25 = vmul.f32 0.5, %v2232_v50 }
 0x1d2   :  { %v2361_v26 = vpop.f32.mrb[30].mxu0  ;;  %1457 = vmatprep.subr.bf16.mxu1 %v1378_v41  ;;  %v914_v53 = vmul.f32 0.70710677, %v2271_v61  ;;  %v1690_v0 = vpop.eup %1689  ;;  %v1165_v20 = vadd.f32 1.0, %v1688_v36  ;;  %v2381_v60 = vmul.f32 0.5, %v2239_v18  ;;  %1703 = verf.f32 %v913_v59 }
 0x1d3   :  { %v2369_v32 = vpop.f32.mrb[31].mxu0  ;;  %v1349_v45 = vpack.c.bf16 %v2366_v33, %v2364_v17  ;;  %1458 = vmatpush1.bf16.msra.mxu1 %v1377_v54  ;;  %v1692_v50 = vpop.eup %1691  ;;  %v1292_v57 = vmul.f32 %v1164_v44, %v2283_v42  ;;  %v723_v62 = vmul.f32 0.5, %v2245_v28  ;;  %1705 = verf.f32 %v852_v47 }
 0x1d4   :  { %v2386_v56 = vpop.f32.mrb[28].mxu1  ;;  %v915_v39 = vmul.f32 0.70710677, %v2277_v27  ;;  %v1167_v18 = vadd.f32 1.0, %v1692_v50  ;;  %1707 = verf.f32 %v914_v53  ;;  %v916_v6 = vmul.f32 0.70710677, %v2288_v16 }
 0x1d5   :  { %v2391_v14 = vpop.f32.mrb[29].mxu1  ;;  %v1694_v2 = vpop.eup %1693  ;;  %v1348_v55 = vpack.c.bf16 %v1228_v4, %v2326_v11  ;;  %v2398_v21 = vmul.f32 %v1102_v9, %v2293_v8  ;;  %v1104_v42 = vadd.f32 1.0, %v1690_v0  ;;  %v2401_v28 = vmul.f32 0.5, %v2251_v43 }
 0x1d6   :  { %v2395_v51 = vpop.f32.mrb[30].mxu1  ;;  %v1696_v54 = vpop.eup %1695  ;;  %1709 = verf.f32 %v915_v39  ;;  %v2408_v47 = vmul.f32 %v1165_v20, %v2321_v1  ;;  %v2410_v41 = vmul.f32 %v1167_v18, %v783_v31  ;;  %v2413_v11 = vmul.f32 0.5, %v2267_v10 }
 0x1d7   :  { %v2403_v34 = vpop.f32.mrb[31].mxu1  ;;  %1418 = vmatprep.subr.bf16.mxu0 %v1348_v55  ;;  %v853_v8 = vmul.f32 0.70710677, %v2290_v19  ;;  %v1166_v36 = vadd.f32 1.0, %v1694_v2  ;;  %v2419_v59 = vmul.f32 0.5, %v2271_v61  ;;  %1711 = verf.f32 %v916_v6 }
 0x1d8   :  { %v2405_v44 = vpop.f32.mrb[32].mxu0  ;;  %v1698_v43 = vpop.eup %1697  ;;  %1419 = vmatpush1.bf16.msra.mxu0 %v1347_v40  ;;  %v855_v1 = vmul.f32 0.70710677, %v2307_v30  ;;  %v1381_v10 = vpack.c.bf16 %v2410_v41, %v2408_v47  ;;  %v854_v53 = vmul.f32 0.70710677, %v2296_v24  ;;  %v1232_v20 = vmul.f32 %v1104_v42, %v2317_v29 }
 0x1d9   :  { %v2416_v4 = vpop.f32.mrb[33].mxu0  ;;  %v1105_v9 = vadd.f32 1.0, %v1698_v43  ;;  %1713 = verf.f32 %v853_v8  ;;  %v1700_v61 = vpop.eup %1699  ;;  %v787_v50 = vmul.f32 0.5, %v2277_v27  ;;  %v2435_v37 = vmul.f32 0.5, %v2288_v16 }
 0x1da   :  { %v2425_v31 = vpop.f32.mrb[34].mxu0  ;;  %v1380_v38 = vpack.c.bf16 %v1292_v57, %v2372_v48  ;;  %v1702_v40 = vpop.eup %1701  ;;  %v1168_v39 = vadd.f32 1.0, %v1696_v54  ;;  %v1107_v2 = vadd.f32 1.0, %v1700_v61  ;;  %1715 = verf.f32 %v855_v1 }
 0x1db   :  { %v2430_v0 = vpop.f32.mrb[35].mxu0  ;;  %v856_v18 = vmul.f32 0.70710677, %v2312_v5  ;;  %v2442_v55 = vmul.f32 %v1166_v36, %v2342_v13  ;;  %v2445_v29 = vmul.f32 0.5, %v2290_v19  ;;  %v2448_v27 = vmul.f32 0.5, %v2296_v24 }
 0x1dc   :  { %v2439_v6 = vpop.f32.mrb[32].mxu1  ;;  %1459 = vmatprep.subr.bf16.mxu1 %v1380_v38  ;;  %v917_v16 = vmul.f32 0.70710677, %v2323_v15  ;;  %v1704_v57 = vpop.eup %1703  ;;  %v2454_v54 = vmul.f32 %v1105_v9, %v2375_v25  ;;  %v2456_v42 = vmul.f32 %v1107_v2, %v723_v62  ;;  %1717 = verf.f32 %v854_v53 }
 0x1dd   :  { %v2451_v48 = vpop.f32.mrb[33].mxu1  ;;  %1460 = vmatpush1.bf16.msra.mxu1 %v1379_v7  ;;  %v918_v19 = vmul.f32 0.70710677, %v2339_v12  ;;  %v1706_v13 = vpop.eup %1705  ;;  %v1106_v8 = vadd.f32 1.0, %v1702_v40  ;;  %v1169_v43 = vadd.f32 1.0, %v1704_v57  ;;  %v1296_v9 = vmul.f32 %v1168_v39, %v2353_v46 }
 0x1de   :  { %v2462_v24 = vpop.f32.mrb[34].mxu1  ;;  %1719 = verf.f32 %v917_v16  ;;  %v919_v36 = vmul.f32 0.70710677, %v2345_v63  ;;  %v1708_v62 = vpop.eup %1707  ;;  %v727_v52 = vmul.f32 0.5, %v2307_v30  ;;  %v2476_v61 = vmul.f32 0.5, %v2312_v5 }
 0x1df   :  { %v2465_v1 = vpop.f32.mrb[35].mxu1  ;;  %1721 = verf.f32 %v856_v18  ;;  %v920_v38 = vmul.f32 0.70710677, %v2355_v35  ;;  %v1350_v40 = vpack.c.bf16 %v1232_v20, %v2398_v21  ;;  %v1108_v46 = vadd.f32 1.0, %v1706_v13 }
 0x1e0   :  { %v2467_v25 = vpop.f32.mrb[36].mxu0  ;;  %v1710_v53 = vpop.eup %1709  ;;  %1723 = verf.f32 %v919_v36  ;;  %v2483_v16 = vmul.f32 0.5, %v2323_v15  ;;  %v857_v30 = vmul.f32 0.70710677, %v2347_v22  ;;  %v2489_v5 = vmul.f32 %v1106_v8, %v2381_v60 }
 0x1e1   :  { %v2473_v7 = vpop.f32.mrb[37].mxu0  ;;  %v1171_v39 = vadd.f32 1.0, %v1710_v53  ;;  %v1712_v57 = vpop.eup %1711  ;;  %v2492_v36 = vmul.f32 %v1169_v43, %v2413_v11  ;;  %v1170_v23 = vadd.f32 1.0, %v1708_v62  ;;  %1725 = verf.f32 %v918_v19  ;;  %1420 = vmatprep.subr.bf16.mxu0 %v1350_v40 }
 0x1e2   :  { %v2480_v2 = vpop.f32.mrb[38].mxu0  ;;  %1727 = verf.f32 %v857_v30  ;;  %1421 = vmatpush1.bf16.msra.mxu0 %v1349_v45  ;;  %v858_v15 = vmul.f32 0.70710677, %v2357_v49  ;;  %v859_v13 = vmul.f32 0.70710677, %v2361_v26  ;;  %v2504_v11 = vmul.f32 0.5, %v2339_v12 }
 0x1e3   :  { %v2486_v18 = vpop.f32.mrb[39].mxu0  ;;  %v1714_v21 = vpop.eup %1713  ;;  %v2494_v20 = vmul.f32 %v1171_v39, %v787_v50  ;;  %v791_v19 = vmul.f32 0.5, %v2345_v63  ;;  %1729 = verf.f32 %v920_v38  ;;  %v1236_v62 = vmul.f32 %v1108_v46, %v2401_v28 }
 0x1e4   :  { %v2501_v60 = vpop.f32.mrb[36].mxu1  ;;  %v1109_v8 = vadd.f32 1.0, %v1714_v21  ;;  %v1716_v43 = vpop.eup %1715  ;;  %v2513_v33 = vmul.f32 0.5, %v2355_v35  ;;  %1731 = verf.f32 %v859_v13  ;;  %v1172_v53 = vadd.f32 1.0, %v1712_v57 }
 0x1e5   :  { %v2507_v50 = vpop.f32.mrb[37].mxu1  ;;  %v1111_v12 = vadd.f32 1.0, %v1716_v43  ;;  %v860_v40 = vmul.f32 0.70710677, %v2369_v32  ;;  %v1382_v63 = vpack.c.bf16 %v1296_v9, %v2442_v55  ;;  %v2524_v46 = vmul.f32 %v1170_v23, %v2419_v59 }
 0x1e6   :  { %v2515_v45 = vpop.f32.mrb[38].mxu1  ;;  %v1718_v28 = vpop.eup %1717  ;;  %v2527_v35 = vmul.f32 0.5, %v2347_v22  ;;  %1733 = verf.f32 %v858_v15  ;;  %v921_v30 = vmul.f32 0.70710677, %v2386_v56  ;;  %v2533_v13 = vmul.f32 %v1109_v8, %v2445_v29 }
 0x1e7   :  { %v2519_v38 = vpop.f32.mrb[39].mxu1  ;;  %v2535_v55 = vmul.f32 %v1111_v12, %v727_v52  ;;  %v2538_v9 = vmul.f32 0.5, %v2357_v49  ;;  %1461 = vmatprep.subr.bf16.mxu1 %v1382_v63  ;;  %v922_v59 = vmul.f32 0.70710677, %v2391_v14  ;;  %v731_v43 = vmul.f32 0.5, %v2361_v26 }
 0x1e8   :  { %v2521_v39 = vpop.f32.mrb[40].mxu0  ;;  %v1720_v21 = vpop.eup %1719  ;;  %1735 = verf.f32 %v921_v30  ;;  %1462 = vmatpush1.bf16.msra.mxu1 %v1381_v10  ;;  %v923_v29 = vmul.f32 0.70710677, %v2395_v51  ;;  %v1300_v8 = vmul.f32 %v1172_v53, %v2435_v37  ;;  %v1110_v12 = vadd.f32 1.0, %v1718_v28 }
 0x1e9   :  { %v2530_v57 = vpop.f32.mrb[41].mxu0  ;;  %v1722_v22 = vpop.eup %1721  ;;  %v1173_v15 = vadd.f32 1.0, %v1720_v21  ;;  %1737 = verf.f32 %v860_v40  ;;  %v2554_v26 = vmul.f32 0.5, %v2369_v32  ;;  %v924_v47 = vmul.f32 0.70710677, %v2403_v34 }
 0x1ea   :  { %v2541_v23 = vpop.f32.mrb[42].mxu0  ;;  %v1724_v49 = vpop.eup %1723  ;;  %1739 = verf.f32 %v923_v29  ;;  %v1112_v30 = vadd.f32 1.0, %v1722_v22  ;;  %v1352_v17 = vpack.c.bf16 %v1236_v62, %v2489_v5  ;;  %v861_v37 = vmul.f32 0.70710677, %v2405_v44 }
 0x1eb   :  { %v2548_v52 = vpop.f32.mrb[43].mxu0  ;;  %v1175_v21 = vadd.f32 1.0, %v1724_v49  ;;  %v1726_v10 = vpop.eup %1725  ;;  %1741 = verf.f32 %v922_v59  ;;  %v2564_v40 = vmul.f32 %v1173_v15, %v2483_v16  ;;  %v2569_v29 = vmul.f32 0.5, %v2386_v56 }
 0x1ec   :  { %v2557_v41 = vpop.f32.mrb[40].mxu1  ;;  %v1728_v28 = vpop.eup %1727  ;;  %1743 = verf.f32 %v924_v47  ;;  %v2574_v59 = vmul.f32 %v1110_v12, %v2448_v27  ;;  %1422 = vmatprep.subr.bf16.mxu0 %v1352_v17  ;;  %v862_v62 = vmul.f32 0.70710677, %v2416_v4  ;;  %v1174_v15 = vadd.f32 1.0, %v1726_v10 }
 0x1ed   :  { %v2561_v53 = vpop.f32.mrb[41].mxu1  ;;  %v2566_v32 = vmul.f32 %v1175_v21, %v791_v19  ;;  %v1730_v22 = vpop.eup %1729  ;;  %v1113_v5 = vadd.f32 1.0, %v1728_v28  ;;  %1745 = verf.f32 %v861_v37  ;;  %v2584_v21 = vmul.f32 0.5, %v2391_v14 }
 0x1ee   :  { %v2571_v49 = vpop.f32.mrb[42].mxu1  ;;  %v1732_v19 = vpop.eup %1731  ;;  %v3100_v27 = vpack.c.bf16 %v2456_v42, %v2454_v54  ;;  %v863_v17 = vmul.f32 0.70710677, %v2425_v31  ;;  %v1240_v47 = vmul.f32 %v1112_v30, %v2476_v61  ;;  %v795_v28 = vmul.f32 0.5, %v2395_v51 }
 0x1ef   :  { %v2577_v63 = vpop.f32.mrb[43].mxu1  ;;  %v1115_v37 = vadd.f32 1.0, %v1732_v19  ;;  %v2595_v10 = vmul.f32 0.5, %v2403_v34  ;;  %v1176_v3 = vadd.f32 1.0, %v1730_v22  ;;  %v864_v54 = vmul.f32 0.70710677, %v2430_v0 }
 0x1f0   :  { %v2579_v16 = vpop.f32.mrb[44].mxu0  ;;  %1423 = vmatpush1.bf16.msra.mxu0 %v3100_v27  ;;  %v1734_v14 = vpop.eup %1733  ;;  %1747 = verf.f32 %v863_v17  ;;  %v1384_v42 = vpack.c.bf16 %v1300_v8, %v2524_v46  ;;  %v2604_v58 = vmul.f32 %v1113_v5, %v2527_v35  ;;  %v925_v51 = vmul.f32 0.70710677, %v2439_v6 }
 0x1f1   :  { %v2590_v12 = vpop.f32.mrb[45].mxu0  ;;  %v2606_v61 = vmul.f32 %v1115_v37, %v731_v43  ;;  %1749 = verf.f32 %v862_v62  ;;  %v2610_v30 = vmul.f32 %v1174_v15, %v2504_v11  ;;  %v2613_v22 = vmul.f32 0.5, %v2405_v44 }
 0x1f2   :  { %v2597_v56 = vpop.f32.mrb[46].mxu0  ;;  %v1736_v34 = vpop.eup %1735  ;;  %v2616_v19 = vmul.f32 0.5, %v2416_v4  ;;  %1463 = vmatprep.subr.bf16.mxu1 %v1384_v42  ;;  %v926_v46 = vmul.f32 0.70710677, %v2451_v48  ;;  %v1114_v8 = vadd.f32 1.0, %v1734_v14  ;;  %1751 = verf.f32 %v925_v51 }
 0x1f3   :  { %v2601_v27 = vpop.f32.mrb[47].mxu0  ;;  %v1738_v43 = vpop.eup %1737  ;;  %v1177_v62 = vadd.f32 1.0, %v1736_v34  ;;  %v3101_v11 = vpack.c.bf16 %v2494_v20, %v2492_v36  ;;  %v1304_v15 = vmul.f32 %v1176_v3, %v2513_v33  ;;  %v735_v17 = vmul.f32 0.5, %v2425_v31 }
 0x1f4   :  { %v2619_v35 = vpop.f32.mrb[44].mxu1  ;;  %v1740_v4 = vpop.eup %1739  ;;  %1753 = verf.f32 %v864_v54  ;;  %v927_v37 = vmul.f32 0.70710677, %v2462_v24  ;;  %v928_v51 = vmul.f32 0.70710677, %v2465_v1  ;;  %v1354_v36 = vpack.c.bf16 %v1240_v47, %v2574_v59 }
 0x1f5   :  { %1464 = vmatpush1.bf16.msra.mxu1 %v3101_v11  ;;  %v2626_v44 = vpop.f32.mrb[45].mxu1  ;;  %v1742_v42 = vpop.eup %1741  ;;  %v1179_v5 = vadd.f32 1.0, %v1740_v4  ;;  %1755 = verf.f32 %v926_v46  ;;  %v1116_v3 = vadd.f32 1.0, %v1738_v43  ;;  %v2640_v31 = vmul.f32 0.5, %v2430_v0 }
 0x1f6   :  { %v2631_v14 = vpop.f32.mrb[46].mxu1  ;;  %v1744_v11 = vpop.eup %1743  ;;  %1757 = verf.f32 %v927_v37  ;;  %v865_v33 = vmul.f32 0.70710677, %v2467_v25  ;;  %v2646_v46 = vmul.f32 %v1114_v8, %v2538_v9  ;;  %v2649_v59 = vmul.f32 %v1177_v62, %v2569_v29  ;;  %1424 = vmatprep.subr.bf16.mxu0 %v1354_v36 }
 0x1f7   :  { %v2635_v20 = vpop.f32.mrb[47].mxu1  ;;  %v1746_v4 = vpop.eup %1745  ;;  %v2651_v47 = vmul.f32 %v1179_v5, %v795_v28  ;;  %1759 = verf.f32 %v928_v51  ;;  %v1178_v0 = vadd.f32 1.0, %v1742_v42  ;;  %v2656_v37 = vmul.f32 0.5, %v2439_v6 }
 0x1f8   :  { %v2637_v34 = vpop.f32.mrb[48].mxu0  ;;  %1761 = verf.f32 %v865_v33  ;;  %v3103_v9 = vpack.c.bf16 %v2535_v55, %v2533_v13  ;;  %v1117_v8 = vadd.f32 1.0, %v1746_v4  ;;  %v866_v5 = vmul.f32 0.70710677, %v2473_v7 }
 0x1f9   :  { %3102 = vst [vmem:[#allocation7_spill] sm:$0xff] %v2637_v34  ;;  %v2643_v54 = vpop.f32.mrb[49].mxu0  ;;  %v2659_v34 = vmul.f32 0.5, %v2451_v48  ;;  %v867_v62 = vmul.f32 0.70710677, %v2480_v2  ;;  %v1244_v42 = vmul.f32 %v1116_v3, %v2554_v26  ;;  %v1180_v48 = vadd.f32 1.0, %v1744_v11 }
 0x1fa   :  { %v2653_v43 = vpop.f32.mrb[50].mxu0  ;;  %1425 = vmatpush1.bf16.msra.mxu0 %v3103_v9  ;;  %v1748_v6 = vpop.eup %1747  ;;  %v799_v51 = vmul.f32 0.5, %v2462_v24  ;;  %v2673_v36 = vmul.f32 0.5, %v2465_v1  ;;  %v868_v4 = vmul.f32 0.70710677, %v2486_v18  ;;  %v1386_v9 = vpack.c.bf16 %v1304_v15, %v2610_v30 }
 0x1fb   :  { %v2664_v29 = vpop.f32.mrb[51].mxu0  ;;  %v1750_v55 = vpop.eup %1749  ;;  %v1119_v33 = vadd.f32 1.0, %v1748_v6  ;;  %1763 = verf.f32 %v867_v62  ;;  %v2685_v26 = vmul.f32 0.5, %v2467_v25  ;;  %v2688_v24 = vmul.f32 0.5, %v2473_v7 }
 0x1fc   :  { %3104 = vst [vmem:[#allocation8_spill] sm:$0xff] %v2664_v29  ;;  %v2675_v13 = vpop.f32.mrb[48].mxu1  ;;  %v2682_v29 = vmul.f32 %v1178_v0, %v2584_v21  ;;  %v929_v1 = vmul.f32 0.70710677, %v2501_v60  ;;  %v1752_v3 = vpop.eup %1751  ;;  %v2694_v62 = vmul.f32 %v1117_v8, %v2613_v22  ;;  %1765 = verf.f32 %v866_v5  ;;  %1465 = vmatprep.subr.bf16.mxu1 %v1386_v9 }
 0x1fd   :  { %v2679_v28 = vpop.f32.mrb[49].mxu1  ;;  %v2696_v30 = vmul.f32 %v1119_v33, %v735_v17  ;;  %v930_v21 = vmul.f32 0.70710677, %v2507_v50  ;;  %v1118_v0 = vadd.f32 1.0, %v1750_v55  ;;  %v739_v6 = vmul.f32 0.5, %v2480_v2 }
 0x1fe   :  { %v2691_v11 = vpop.f32.mrb[50].mxu1  ;;  %v1754_v7 = vpop.eup %1753  ;;  %1767 = verf.f32 %v929_v1  ;;  %v931_v22 = vmul.f32 0.70710677, %v2515_v45  ;;  %v1308_v5 = vmul.f32 %v1180_v48, %v2595_v10  ;;  %v1181_v9 = vadd.f32 1.0, %v1752_v3 }
 0x1ff   :  { %3105 = vst [vmem:[#allocation9_spill] sm:$0xff] %v2691_v11  ;;  %v2699_v15 = vpop.f32.mrb[51].mxu1  ;;  %v3106_v11 = vpack.c.bf16 %v2566_v32, %v2564_v40  ;;  %v1756_v8 = vpop.eup %1755  ;;  %1769 = verf.f32 %v868_v4  ;;  %v2716_v1 = vmul.f32 0.5, %v2486_v18  ;;  %v932_v40 = vmul.f32 0.70710677, %v2519_v38 }
 0x200   :  { %v2701_v25 = vpop.f32.mrb[52].mxu0  ;;  %v1758_v2 = vpop.eup %1757  ;;  %1771 = verf.f32 %v931_v22  ;;  %v1356_v32 = vpack.c.bf16 %v1244_v42, %v2646_v46  ;;  %v1120_v10 = vadd.f32 1.0, %v1754_v7  ;;  %v869_v3 = vmul.f32 0.70710677, %v2521_v39 }
 0x201   :  { %1466 = vmatpush1.bf16.msra.mxu1 %v3106_v11  ;;  %v2708_v17 = vpop.f32.mrb[53].mxu0  ;;  %v1183_v48 = vadd.f32 1.0, %v1758_v2  ;;  %1773 = verf.f32 %v930_v21  ;;  %v2724_v33 = vmul.f32 %v1118_v0, %v2616_v19  ;;  %v2727_v18 = vmul.f32 0.5, %v2501_v60 }
 0x202   :  { %3107 = vst [vmem:[#allocation10_spill] sm:$0xff] %v2708_v17  ;;  %v2713_v55 = vpop.f32.mrb[54].mxu0  ;;  %v1760_v17 = vpop.eup %1759  ;;  %v2730_v22 = vmul.f32 0.5, %v2507_v50  ;;  %1426 = vmatprep.subr.bf16.mxu0 %v1356_v32  ;;  %v2735_v42 = vmul.f32 %v1181_v9, %v2656_v37  ;;  %1775 = verf.f32 %v869_v3  ;;  %v3109_v19 = vpack.c.bf16 %v2606_v61, %v2604_v58 }
 0x203   :  { %3108 = vst [vmem:[#allocation11_spill] sm:$0xff] %v2713_v55  ;;  %v2720_v11 = vpop.f32.mrb[55].mxu0  ;;  %v1762_v4 = vpop.eup %1761  ;;  %v1182_v55 = vadd.f32 1.0, %v1756_v8  ;;  %v2737_v21 = vmul.f32 %v1183_v48, %v799_v51  ;;  %v870_v7 = vmul.f32 0.70710677, %v2530_v57  ;;  %v803_v50 = vmul.f32 0.5, %v2515_v45 }
 0x204   :  { %v2732_v46 = vpop.f32.mrb[52].mxu1  ;;  %1427 = vmatpush1.bf16.msra.mxu0 %v3109_v19  ;;  %v1121_v0 = vadd.f32 1.0, %v1762_v4  ;;  %1777 = verf.f32 %v932_v40  ;;  %v871_v8 = vmul.f32 0.70710677, %v2541_v23  ;;  %v1248_v51 = vmul.f32 %v1120_v10, %v2640_v31 }
 0x205   :  { %v2743_v60 = vpop.f32.mrb[53].mxu1  ;;  %v1764_v37 = vpop.eup %1763  ;;  %v1184_v58 = vadd.f32 1.0, %v1760_v17  ;;  %v2753_v61 = vmul.f32 0.5, %v2519_v38  ;;  %v872_v40 = vmul.f32 0.70710677, %v2548_v52  ;;  %v1388_v3 = vpack.c.bf16 %v1308_v5, %v2682_v29 }
 0x206   :  { %v2747_v2 = vpop.f32.mrb[54].mxu1  ;;  %v1123_v45 = vadd.f32 1.0, %v1764_v37  ;;  %1779 = verf.f32 %v871_v8  ;;  %v1766_v31 = vpop.eup %1765  ;;  %v2764_v10 = vmul.f32 %v1182_v55, %v2659_v34  ;;  %v2767_v17 = vmul.f32 0.5, %v2521_v39 }
 0x207   :  { %v2755_v32 = vpop.f32.mrb[55].mxu1  ;;  %1781 = verf.f32 %v870_v7  ;;  %v933_v38 = vmul.f32 0.70710677, %v2557_v41  ;;  %v2773_v8 = vmul.f32 %v1121_v0, %v2685_v26  ;;  %v2778_v29 = vmul.f32 0.5, %v2530_v57  ;;  %1467 = vmatprep.subr.bf16.mxu1 %v1388_v3 }
 0x208   :  { %v2757_v48 = vpop.f32.mrb[56].mxu0  ;;  %v1768_v37 = vpop.eup %1767  ;;  %v2775_v9 = vmul.f32 %v1123_v45, %v739_v6  ;;  %v934_v34 = vmul.f32 0.70710677, %v2561_v53  ;;  %v743_v7 = vmul.f32 0.5, %v2541_v23  ;;  %v935_v26 = vmul.f32 0.70710677, %v2571_v49 }
 0x209   :  { %v2761_v4 = vpop.f32.mrb[57].mxu0  ;;  %v1770_v39 = vpop.eup %1769  ;;  %v1185_v55 = vadd.f32 1.0, %v1768_v37  ;;  %1783 = verf.f32 %v933_v38  ;;  %v1312_v57 = vmul.f32 %v1184_v58, %v2673_v36  ;;  %v1122_v0 = vadd.f32 1.0, %v1766_v31 }
 0x20a   :  { %v2770_v19 = vpop.f32.mrb[58].mxu0  ;;  %v1772_v6 = vpop.eup %1771  ;;  %1785 = verf.f32 %v872_v40  ;;  %v2794_v23 = vmul.f32 0.5, %v2548_v52  ;;  %v1124_v38 = vadd.f32 1.0, %v1770_v39  ;;  %v1358_v36 = vpack.c.bf16 %v1248_v51, %v2724_v33 }
 0x20b   :  { %3110 = vst [vmem:[#allocation12_spill] sm:$0xff] %v2770_v19  ;;  %v2781_v5 = vpop.f32.mrb[59].mxu0  ;;  %v3112_v19 = vpack.c.bf16 %v2651_v47, %v2649_v59  ;;  %v1774_v37 = vpop.eup %1773  ;;  %1787 = verf.f32 %v935_v26  ;;  %v936_v59 = vmul.f32 0.70710677, %v2577_v63  ;;  %v873_v58 = vmul.f32 0.70710677, %v2579_v16 }
 0x20c   :  { %3111 = vst [vmem:[#allocation13_spill] sm:$0xff] %v2781_v5  ;;  %v2791_v3 = vpop.f32.mrb[56].mxu1  ;;  %v1187_v5 = vadd.f32 1.0, %v1772_v6  ;;  %1789 = verf.f32 %v934_v34  ;;  %v1776_v40 = vpop.eup %1775  ;;  %v2809_v52 = vmul.f32 0.5, %v2557_v41  ;;  %v2816_v33 = vmul.f32 %v1122_v0, %v2688_v24  ;;  %1428 = vmatprep.subr.bf16.mxu0 %v1358_v36 }
 0x20d   :  { %1468 = vmatpush1.bf16.msra.mxu1 %v3112_v19  ;;  %v2797_v47 = vpop.f32.mrb[57].mxu1  ;;  %v2804_v19 = vmul.f32 %v1185_v55, %v2727_v18  ;;  %1791 = verf.f32 %v936_v59  ;;  %v1186_v51 = vadd.f32 1.0, %v1774_v37  ;;  %v874_v18 = vmul.f32 0.70710677, %v2590_v12 }
 0x20e   :  { %v2801_v31 = vpop.f32.mrb[58].mxu1  ;;  %v2806_v6 = vmul.f32 %v1187_v5, %v803_v50  ;;  %v1778_v34 = vpop.eup %1777  ;;  %1793 = verf.f32 %v873_v58  ;;  %v1125_v50 = vadd.f32 1.0, %v1776_v40  ;;  %v2824_v5 = vmul.f32 0.5, %v2561_v53 }
 0x20f   :  { %v2811_v26 = vpop.f32.mrb[59].mxu1  ;;  %v3114_v59 = vpack.c.bf16 %v2696_v30, %v2694_v62  ;;  %v875_v24 = vmul.f32 0.70710677, %v2597_v56  ;;  %v1252_v36 = vmul.f32 %v1124_v38, %v2716_v1  ;;  %v807_v58 = vmul.f32 0.5, %v2571_v49 }
 0x210   :  { %v2813_v39 = vpop.f32.mrb[60].mxu0  ;;  %v1780_v37 = vpop.eup %1779  ;;  %v2835_v45 = vmul.f32 0.5, %v2577_v63  ;;  %v876_v40 = vmul.f32 0.70710677, %v2601_v27  ;;  %v1390_v30 = vpack.c.bf16 %v1312_v57, %v2764_v10  ;;  %v2845_v1 = vmul.f32 0.5, %v2579_v16 }
 0x211   :  { %v2819_v55 = vpop.f32.mrb[61].mxu0  ;;  %1429 = vmatpush1.bf16.msra.mxu0 %v3114_v59  ;;  %v1782_v41 = vpop.eup %1781  ;;  %v1127_v62 = vadd.f32 1.0, %v1780_v37  ;;  %1795 = verf.f32 %v875_v24  ;;  %v2842_v59 = vmul.f32 %v1186_v51, %v2730_v22  ;;  %v937_v63 = vmul.f32 0.70710677, %v2619_v35 }
 0x212   :  { %3113 = vst [vmem:[#allocation14_spill] sm:$0xff] %v2819_v55  ;;  %v2830_v0 = vpop.f32.mrb[62].mxu0  ;;  %v1188_v55 = vadd.f32 1.0, %v1778_v34  ;;  %1797 = verf.f32 %v874_v18  ;;  %1469 = vmatprep.subr.bf16.mxu1 %v1390_v30  ;;  %v938_v10 = vmul.f32 0.70710677, %v2626_v44  ;;  %v1126_v16 = vadd.f32 1.0, %v1782_v41 }
 0x213   :  { %v2838_v53 = vpop.f32.mrb[63].mxu0  ;;  %v1784_v38 = vpop.eup %1783  ;;  %v2853_v34 = vmul.f32 %v1127_v62, %v743_v7  ;;  %1799 = verf.f32 %v876_v40  ;;  %v3116_v18 = vpack.c.bf16 %v2737_v21, %v2735_v42  ;;  %v939_v24 = vmul.f32 0.70710677, %v2631_v14 }
 0x214   :  { %3115 = vst [vmem:[#allocation15_spill] sm:$0xff] %v2838_v53  ;;  %v2848_v49 = vpop.f32.mrb[60].mxu1  ;;  %v2851_v53 = vmul.f32 %v1125_v50, %v2767_v17  ;;  %v1786_v57 = vpop.eup %1785  ;;  %v1189_v51 = vadd.f32 1.0, %v1784_v38  ;;  %1801 = verf.f32 %v937_v63  ;;  %v1316_v50 = vmul.f32 %v1188_v55, %v2753_v61 }
 0x215   :  { %v2856_v22 = vpop.f32.mrb[61].mxu1  ;;  %1470 = vmatpush1.bf16.msra.mxu1 %v3116_v18  ;;  %v1788_v7 = vpop.eup %1787  ;;  %v2868_v40 = vmul.f32 0.5, %v2590_v12  ;;  %v747_v41 = vmul.f32 0.5, %v2597_v56  ;;  %v2874_v21 = vmul.f32 0.5, %v2601_v27  ;;  %1803 = verf.f32 %v939_v24  ;;  %v3119_v18 = vld [vmem:[#allocation7_spill] sm:$0xff] }
 0x216   :  { %v2862_v17 = vpop.f32.mrb[62].mxu1  ;;  %v1790_v30 = vpop.eup %1789  ;;  %v1191_v42 = vadd.f32 1.0, %v1788_v7  ;;  %v940_v63 = vmul.f32 0.70710677, %v2635_v20  ;;  %v1128_v61 = vadd.f32 1.0, %v1786_v57  ;;  %1805 = verf.f32 %v938_v10 }
 0x217   :  { %3117 = vst [vmem:[#allocation16_spill] sm:$0xff] %v2862_v17  ;;  %v2871_v62 = vpop.f32.mrb[63].mxu1  ;;  %v1792_v38 = vpop.eup %1791  ;;  %v1360_v55 = vpack.c.bf16 %v1252_v36, %v2816_v33  ;;  %v877_v12 = vmul.f32 0.70710677, %v3119_v18  ;;  %v1254_v56 = vmul.f32 %v1126_v16, %v2778_v29  ;;  %v1190_v27 = vadd.f32 1.0, %v1790_v30 }
 0x218   :  { %3118 = vst [vmem:[#allocation17_spill] sm:$0xff] %v2871_v62  ;;  %v1794_v37 = vpop.eup %1793  ;;  %v2881_v62 = vmul.f32 %v1189_v51, %v2809_v52  ;;  %v2883_v7 = vmul.f32 %v1191_v42, %v807_v58  ;;  %1807 = verf.f32 %v940_v63  ;;  %v809_v24 = vmul.f32 0.5, %v2619_v35 }
 0x219   :  { %v2887_v17 = vmul.f32 0.5, %v2626_v44  ;;  %1430 = vmatprep.subr.bf16.mxu0 %v1360_v55  ;;  %1809 = verf.f32 %v877_v12  ;;  %v1129_v36 = vadd.f32 1.0, %v1794_v37  ;;  %v3120_v29 = vpack.c.bf16 %v2775_v9, %v2773_v8  ;;  %v3121_v37 = vld [vmem:[#allocation8_spill] sm:$0xff] }
 0x21a   :  { %v1393_v33 = vpack.c.bf16 %v2883_v7, %v2881_v62  ;;  %v878_v52 = vmul.f32 0.70710677, %v2643_v54  ;;  %v879_v58 = vmul.f32 0.70710677, %v2653_v43  ;;  %v1256_v35 = vmul.f32 %v1128_v61, %v2794_v23 }
 0x21b   :  { %1431 = vmatpush1.bf16.msra.mxu0 %v3120_v29  ;;  %v1796_v10 = vpop.eup %1795  ;;  %v1192_v57 = vadd.f32 1.0, %v1792_v38  ;;  %v811_v44 = vmul.f32 0.5, %v2631_v14  ;;  %v2899_v16 = vmul.f32 0.5, %v2635_v20  ;;  %v880_v42 = vmul.f32 0.70710677, %v3121_v37 }
 0x21c   :  { %v1798_v51 = vpop.eup %1797  ;;  %v1131_v30 = vadd.f32 1.0, %v1796_v10  ;;  %1811 = verf.f32 %v879_v58  ;;  %v1392_v9 = vpack.c.bf16 %v1316_v50, %v2842_v59  ;;  %v2904_v63 = vmul.f32 %v1190_v27, %v2824_v5 }
 0x21d   :  { %v1800_v8 = vpop.eup %1799  ;;  %v749_v55 = vmul.f32 0.5, %v3119_v18  ;;  %v2908_v23 = vmul.f32 0.5, %v2643_v54  ;;  %v941_v14 = vmul.f32 0.70710677, %v2675_v13  ;;  %v2912_v38 = vmul.f32 %v1129_v36, %v2845_v1  ;;  %v3123_v54 = vld [vmem:[#allocation9_spill] sm:$0xff] }
 0x21e   :  { %v1802_v20 = vpop.eup %1801  ;;  %v2914_v61 = vmul.f32 %v1131_v30, %v747_v41  ;;  %1813 = verf.f32 %v878_v52  ;;  %1471 = vmatprep.subr.bf16.mxu1 %v1392_v9  ;;  %v942_v59 = vmul.f32 0.70710677, %v2679_v28  ;;  %v1130_v50 = vadd.f32 1.0, %v1798_v51 }
 0x21f   :  { %v1193_v5 = vadd.f32 1.0, %v1802_v20  ;;  %1815 = verf.f32 %v941_v14  ;;  %v3122_v18 = vpack.c.bf16 %v2806_v6, %v2804_v19  ;;  %v943_v12 = vmul.f32 0.70710677, %v3123_v54  ;;  %v1804_v27 = vpop.eup %1803  ;;  %v3124_v14 = vld [vmem:[#allocation10_spill] sm:$0xff] }
 0x220   :  { %v1320_v29 = vmul.f32 %v1192_v57, %v2835_v45  ;;  %v1363_v1 = vpack.c.bf16 %v2914_v61, %v2912_v38  ;;  %v751_v41 = vmul.f32 0.5, %v2653_v43  ;;  %1817 = verf.f32 %v880_v42  ;;  %v1806_v36 = vpop.eup %1805 }
 0x221   :  { %1472 = vmatpush1.bf16.msra.mxu1 %v3122_v18  ;;  %v1132_v52 = vadd.f32 1.0, %v1800_v8  ;;  %v1195_v58 = vadd.f32 1.0, %v1804_v27  ;;  %v2926_v10 = vmul.f32 0.5, %v3121_v37  ;;  %1819 = verf.f32 %v943_v12 }
 0x222   :  { %v1808_v19 = vpop.eup %1807  ;;  %1821 = verf.f32 %v942_v59  ;;  %v944_v6 = vmul.f32 0.70710677, %v2699_v15  ;;  %v1362_v51 = vpack.c.bf16 %v1256_v35, %v1254_v56  ;;  %v881_v45 = vmul.f32 0.70710677, %v2701_v25 }
 0x223   :  { %v1810_v57 = vpop.eup %1809  ;;  %v1258_v30 = vmul.f32 %v1130_v50, %v2868_v40  ;;  %v2931_v9 = vmul.f32 %v1193_v5, %v809_v24  ;;  %v2933_v43 = vmul.f32 %v1195_v58, %v811_v44  ;;  %v813_v42 = vmul.f32 0.5, %v2675_v13  ;;  %v3126_v44 = vld [vmem:[#allocation11_spill] sm:$0xff] }
 0x224   :  { %v1194_v8 = vadd.f32 1.0, %v1806_v36  ;;  %v2937_v37 = vmul.f32 0.5, %v2679_v28  ;;  %1432 = vmatprep.subr.bf16.mxu0 %v1362_v51  ;;  %1823 = verf.f32 %v881_v45  ;;  %v882_v20 = vmul.f32 0.70710677, %v3124_v14 }
 0x225   :  { %v1395_v56 = vpack.c.bf16 %v2933_v43, %v2931_v9  ;;  %v1133_v35 = vadd.f32 1.0, %v1810_v57  ;;  %v815_v40 = vmul.f32 0.5, %v3123_v54  ;;  %v3125_v24 = vpack.c.bf16 %v2853_v34, %v2851_v53 }
 0x226   :  { %v883_v13 = vmul.f32 0.70710677, %v3126_v44  ;;  %v1812_v59 = vpop.eup %1811  ;;  %v1260_v28 = vmul.f32 %v1132_v52, %v2874_v21  ;;  %v1196_v50 = vadd.f32 1.0, %v1808_v19  ;;  %v2949_v5 = vmul.f32 0.5, %v2699_v15 }
 0x227   :  { %1433 = vmatpush1.bf16.msra.mxu0 %v3125_v24  ;;  %1825 = verf.f32 %v944_v6  ;;  %v1135_v18 = vadd.f32 1.0, %v1812_v59  ;;  %v884_v12 = vmul.f32 0.70710677, %v2720_v11  ;;  %v1394_v54 = vpack.c.bf16 %v1320_v29, %v2904_v63 }
 0x228   :  { %1827 = verf.f32 %v883_v13  ;;  %v1814_v27 = vpop.eup %1813  ;;  %v2954_v53 = vmul.f32 %v1194_v8, %v2887_v17  ;;  %v753_v34 = vmul.f32 0.5, %v2701_v25  ;;  %v945_v21 = vmul.f32 0.70710677, %v2732_v46 }
 0x229   :  { %1829 = verf.f32 %v882_v20  ;;  %v1816_v36 = vpop.eup %1815  ;;  %v2958_v52 = vmul.f32 %v1133_v35, %v749_v55  ;;  %v2960_v15 = vmul.f32 %v1135_v18, %v751_v41  ;;  %v2963_v58 = vmul.f32 0.5, %v3124_v14  ;;  %1473 = vmatprep.subr.bf16.mxu1 %v1394_v54 }
 0x22a   :  { %v946_v63 = vmul.f32 0.70710677, %v2743_v60  ;;  %v1818_v29 = vpop.eup %1817  ;;  %v1197_v19 = vadd.f32 1.0, %v1816_v36  ;;  %v755_v17 = vmul.f32 0.5, %v3126_v44  ;;  %1831 = verf.f32 %v945_v21  ;;  %1474 = vmatpush1.bf16.msra.mxu1 %v1393_v33 }
 0x22b   :  { %v947_v25 = vmul.f32 0.70710677, %v2747_v2  ;;  %v1820_v55 = vpop.eup %1819  ;;  %v1324_v41 = vmul.f32 %v1196_v50, %v2899_v16  ;;  %v1134_v6 = vadd.f32 1.0, %v1814_v27  ;;  %v1365_v51 = vpack.c.bf16 %v2960_v15, %v2958_v52 }
 0x22c   :  { %1833 = verf.f32 %v884_v12  ;;  %v1822_v45 = vpop.eup %1821  ;;  %v1199_v57 = vadd.f32 1.0, %v1820_v55  ;;  %v2975_v8 = vmul.f32 0.5, %v2720_v11  ;;  %v948_v14 = vmul.f32 0.70710677, %v2755_v32  ;;  %v3128_v12 = vld [vmem:[#allocation13_spill] sm:$0xff] }
 0x22d   :  { %1835 = verf.f32 %v947_v25  ;;  %v1136_v62 = vadd.f32 1.0, %v1818_v29  ;;  %v1364_v7 = vpack.c.bf16 %v1260_v28, %v1258_v30  ;;  %v885_v33 = vmul.f32 0.70710677, %v2757_v48 }
 0x22e   :  { %1837 = verf.f32 %v946_v63  ;;  %v1824_v20 = vpop.eup %1823  ;;  %v2979_v16 = vmul.f32 %v1197_v19, %v813_v42  ;;  %v2981_v35 = vmul.f32 %v1199_v57, %v815_v40  ;;  %v817_v24 = vmul.f32 0.5, %v2732_v46  ;;  %v3127_v46 = vld [vmem:[#allocation12_spill] sm:$0xff] }
 0x22f   :  { %1839 = verf.f32 %v948_v14  ;;  %v1262_v44 = vmul.f32 %v1134_v6, %v2908_v23  ;;  %v1198_v11 = vadd.f32 1.0, %v1822_v45  ;;  %1434 = vmatprep.subr.bf16.mxu0 %v1364_v7  ;;  %v886_v13 = vmul.f32 0.70710677, %v2761_v4 }
 0x230   :  { %1841 = verf.f32 %v885_v33  ;;  %v1397_v30 = vpack.c.bf16 %v2981_v35, %v2979_v16  ;;  %v1137_v28 = vadd.f32 1.0, %v1824_v20  ;;  %v2989_v42 = vmul.f32 0.5, %v2743_v60  ;;  %1435 = vmatpush1.bf16.msra.mxu0 %v1363_v1 }
 0x231   :  { %v1826_v59 = vpop.eup %1825  ;;  %v887_v40 = vmul.f32 0.70710677, %v3127_v46  ;;  %v1264_v50 = vmul.f32 %v1136_v62, %v2926_v10  ;;  %v819_v18 = vmul.f32 0.5, %v2747_v2  ;;  %1843 = verf.f32 %v886_v13  ;;  %v3129_v13 = vld [vmem:[#allocation14_spill] sm:$0xff] }
 0x232   :  { %v1828_v23 = vpop.eup %1827  ;;  %v888_v54 = vmul.f32 0.70710677, %v3128_v12  ;;  %v2999_v36 = vmul.f32 0.5, %v2755_v32  ;;  %v1396_v60 = vpack.c.bf16 %v1324_v41, %v2954_v53  ;;  %v3003_v38 = vmul.f32 %v1198_v11, %v2937_v37 }
 0x233   :  { %v1830_v27 = vpop.eup %1829  ;;  %v1139_v21 = vadd.f32 1.0, %v1828_v23  ;;  %1845 = verf.f32 %v887_v40  ;;  %v1200_v61 = vadd.f32 1.0, %v1826_v59  ;;  %v949_v1 = vmul.f32 0.70710677, %v2791_v3  ;;  %v3130_v23 = vld [vmem:[#allocation15_spill] sm:$0xff] }
 0x234   :  { %1847 = verf.f32 %v888_v54  ;;  %v1832_v10 = vpop.eup %1831  ;;  %v3006_v2 = vmul.f32 %v1137_v28, %v753_v34  ;;  %v757_v29 = vmul.f32 0.5, %v2757_v48  ;;  %1475 = vmatprep.subr.bf16.mxu1 %v1396_v60  ;;  %v950_v32 = vmul.f32 0.70710677, %v2797_v47 }
 0x235   :  { %v3008_v63 = vmul.f32 %v1139_v21, %v755_v17  ;;  %v1138_v25 = vadd.f32 1.0, %v1830_v27  ;;  %v1201_v53 = vadd.f32 1.0, %v1832_v10  ;;  %1849 = verf.f32 %v949_v1  ;;  %1476 = vmatpush1.bf16.msra.mxu1 %v1395_v56 }
 0x236   :  { %v1834_v19 = vpop.eup %1833  ;;  %v951_v37 = vmul.f32 0.70710677, %v2801_v31  ;;  %v758_v17 = vmul.f32 0.5, %v2761_v4  ;;  %v759_v48 = vmul.f32 0.5, %v3127_v46  ;;  %1851 = verf.f32 %v950_v32 }
 0x237   :  { %v1836_v55 = vpop.eup %1835  ;;  %v1367_v34 = vpack.c.bf16 %v3008_v63, %v3006_v2  ;;  %v1328_v6 = vmul.f32 %v1200_v61, %v2949_v5  ;;  %v952_v57 = vmul.f32 0.70710677, %v2811_v26  ;;  %v760_v43 = vmul.f32 0.5, %v3128_v12 }
 0x238   :  { %v1838_v41 = vpop.eup %1837  ;;  %v1203_v45 = vadd.f32 1.0, %v1836_v55  ;;  %1853 = verf.f32 %v951_v37  ;;  %v821_v56 = vmul.f32 0.5, %v2791_v3  ;;  %v1366_v14 = vpack.c.bf16 %v1264_v50, %v1262_v44 }
 0x239   :  { %v1840_v9 = vpop.eup %1839  ;;  %v889_v62 = vmul.f32 0.70710677, %v2813_v39  ;;  %v1266_v4 = vmul.f32 %v1138_v25, %v2963_v58  ;;  %v3026_v33 = vmul.f32 %v1201_v53, %v817_v24  ;;  %1855 = verf.f32 %v952_v57 }
 0x23a   :  { %v1842_v7 = vpop.eup %1841  ;;  %v3028_v20 = vmul.f32 %v1203_v45, %v819_v18  ;;  %v1140_v5 = vadd.f32 1.0, %v1834_v19  ;;  %v822_v11 = vmul.f32 0.5, %v2797_v47  ;;  %1436 = vmatprep.subr.bf16.mxu0 %v1366_v14  ;;  %v890_v59 = vmul.f32 0.70710677, %v3129_v13 }
 0x23b   :  { %1857 = verf.f32 %v889_v62  ;;  %v1844_v28 = vpop.eup %1843  ;;  %v1204_v44 = vadd.f32 1.0, %v1840_v9  ;;  %v1141_v46 = vadd.f32 1.0, %v1842_v7  ;;  %1437 = vmatpush1.bf16.msra.mxu0 %v1365_v51  ;;  %v891_v58 = vmul.f32 0.70710677, %v2830_v0 }
 0x23c   :  { %v1399_v3 = vpack.c.bf16 %v3028_v20, %v3026_v33  ;;  %v1202_v40 = vadd.f32 1.0, %v1838_v41  ;;  %v823_v47 = vmul.f32 0.5, %v2801_v31  ;;  %1859 = verf.f32 %v890_v59 }
 0x23d   :  { %v1846_v24 = vpop.eup %1845  ;;  %v892_v50 = vmul.f32 0.70710677, %v3130_v23  ;;  %v1142_v12 = vadd.f32 1.0, %v1844_v28  ;;  %1861 = verf.f32 %v891_v58  ;;  %v1398_v27 = vpack.c.bf16 %v1328_v6, %v3003_v38  ;;  %v122_v6 = vld [vmem:[%s3082_s2] sm:$0xff]  ;;  %s1899_s2 = smov [#allocation2]  }
 0x23e   :  { %v1848_v18 = vpop.eup %1847  ;;  %v1143_v54 = vadd.f32 1.0, %v1846_v24  ;;  %v1268_v21 = vmul.f32 %v1140_v5, %v2975_v8  ;;  %v953_v52 = vmul.f32 0.70710677, %v2848_v49  ;;  %v1332_v51 = vmul.f32 %v1204_v44, %v2999_v36  ;;  %v3131_v8 = vld [vmem:[#allocation16_spill] sm:$0xff]  ;;  %s1517_s30 = sshll.u32 %s1899_s2, 4  ;;  %s1518_s30 = int_to_ptr.vmem [resolvable:$true] %s1517_s30 }
 0x23f   :  { %v1144_v60 = vadd.f32 1.0, %v1848_v18  ;;  %1863 = verf.f32 %v892_v50  ;;  %v1850_v15 = vpop.eup %1849  ;;  %v1269_v61 = vmul.f32 %v1141_v46, %v757_v29  ;;  %1477 = vmatprep.subr.bf16.mxu1 %v1398_v27  ;;  %v954_v1 = vmul.f32 0.70710677, %v2856_v22  ;;  %s1873_s5 = scalar_lea.vmem %s1518_s30, 256  ;;  %p1878_p1 = scmp.lt.s32.totalorder %s1518_s30, %s1518_s30 }
 0x240   :  { %v1271_v31 = vmul.f32 %v1143_v54, %v759_v48  ;;  %v1852_v10 = vpop.eup %1851  ;;  %v1205_v19 = vadd.f32 1.0, %v1850_v15  ;;  %1865 = verf.f32 %v953_v52  ;;  %1478 = vmatpush1.bf16.msra.mxu1 %v1397_v30  ;;  %v955_v38 = vmul.f32 0.70710677, %v3131_v8  ;;  %v3132_v48 = vld [vmem:[#allocation17_spill] sm:$0xff]  ;;  %p1874_p0 = scmp.ne.s32.totalorder %s1518_s30, %s1873_s5  ;;  %p1879_p2 = scmp.lt.s32.totalorder %s1873_s5, %s1873_s5 }
 0x241   :  { %v1272_v32 = vmul.f32 %v1144_v60, %v760_v43  ;;  %v1330_v53 = vmul.f32 %v1202_v40, %v2989_v42  ;;  %v1270_v37 = vmul.f32 %v1142_v12, %v758_v17  ;;  %1867 = verf.f32 %v954_v1 }
 0x242   :  { %v1854_v25 = vpop.eup %1853  ;;  %v1369_v36 = vpack.c.bf16 %v1271_v31, %v1269_v61  ;;  %v1206_v29 = vadd.f32 1.0, %v1852_v10  ;;  %1869 = verf.f32 %v955_v38  ;;  %v956_v41 = vmul.f32 0.70710677, %v3132_v48  ;;  %p1880_p3 = por %p1879_p2, %p1878_p1 }
 0x243   :  { %v1207_v55 = vadd.f32 1.0, %v1854_v25  ;;  %v1856_v45 = vpop.eup %1855  ;;  %v824_v16 = vmul.f32 0.5, %v2811_v26  ;;  %v1368_v35 = vpack.c.bf16 %v1268_v21, %v1266_v4  ;;  %v1400_v30 = vpack.c.bf16 %v1332_v51, %v1330_v53  ;;  %v3133_v53 = vld [vmem:[#allocation5_spill] sm:$0xff] }
 0x244   :  { %v1370_v57 = vpack.c.bf16 %v1272_v32, %v1270_v37  ;;  %v1333_v42 = vmul.f32 %v1205_v19, %v821_v56  ;;  %v1208_v43 = vadd.f32 1.0, %v1856_v45  ;;  %1871 = verf.f32 %v956_v41  ;;  %p1881_p4 = pnand %p1880_p3, %p1874_p0 }
 0x245   :  { %v1858_v9 = vpop.eup %1857  ;;  %v1335_v17 = vmul.f32 %v1207_v55, %v823_v47  ;;  %1438 = vmatprep.subr.bf16.mxu0 %v1368_v35  ;;  %1479 = vmatprep.subr.bf16.mxu1 %v1400_v30  ;;  %v1583_v14 = vcombine.high %v122_v6, %v122_v6  ;;  %v1334_v7 = vmul.f32 %v1206_v29, %v822_v11  ;;  %v761_v59 = vmul.f32 0.5, %v2813_v39 }
 0x246   :  { %v1860_v62 = vpop.eup %1859  ;;  %v1336_v20 = vmul.f32 %v1208_v43, %v824_v16  ;;  %v1145_v5 = vadd.f32 1.0, %v1858_v9  ;;  %1439 = vmatpush1.bf16.msra.mxu0 %v1367_v34  ;;  %1480 = vmatpush1.bf16.msra.mxu1 %v1399_v3  ;;  %v763_v28 = vmul.f32 0.5, %v2830_v0  ;;  %v762_v11 = vmul.f32 0.5, %v3129_v13  ;;  %v3134_v16 = vld [vmem:[#allocation6_spill] sm:$0xff] }
 0x247   :  { %v1401_v33 = vpack.c.bf16 %v1335_v17, %v1333_v42  ;;  %v1862_v26 = vpop.eup %1861  ;;  %v1146_v4 = vadd.f32 1.0, %v1860_v62  ;;  %1440 = vmatprep.subr.bf16.mxu0 %v1370_v57  ;;  %1444 = vmatprep.mubr.bf16.mxu0 %v1583_v14  ;;  %v764_v58 = vmul.f32 0.5, %v3130_v23  ;;  %v825_v18 = vmul.f32 0.5, %v2848_v49 }
 0x248   :  { %v1147_v44 = vadd.f32 1.0, %v1862_v26  ;;  %v1402_v46 = vpack.c.bf16 %v1336_v20, %v1334_v7  ;;  %1485 = vmatprep.mubr.bf16.mxu1 %v1583_v14  ;;  %v1273_v63 = vmul.f32 %v1145_v5, %v761_v59  ;;  %v827_v13 = vmul.f32 0.5, %v3131_v8 }
 0x249   :  { %v1864_v56 = vpop.eup %1863  ;;  %v1274_v40 = vmul.f32 %v1146_v4, %v762_v11  ;;  %v826_v21 = vmul.f32 0.5, %v2856_v22  ;;  %v828_v60 = vmul.f32 0.5, %v3132_v48  ;;  %v1582_v61 = vcombine.low %v122_v6, %v122_v6 }
 0x24a   :  { %v1148_v24 = vadd.f32 1.0, %v1864_v56  ;;  %v1866_v2 = vpop.eup %1865  ;;  %v1275_v34 = vmul.f32 %v1147_v44, %v763_v28  ;;  %1441 = vmatpush1.bf16.msra.mxu0 %v1369_v36  ;;  %1481 = vmatprep.subr.bf16.mxu1 %v1402_v46 }
 0x24b   :  { %v1868_v3 = vpop.eup %1867  ;;  %v1209_v50 = vadd.f32 1.0, %v1866_v2  ;;  %1482 = vmatpush1.bf16.msra.mxu1 %v1401_v33 }
 0x24c   :  { %v1276_v47 = vmul.f32 %v1148_v24, %v764_v58  ;;  %v1870_v39 = vpop.eup %1869  ;;  %v1371_v0 = vpack.c.bf16 %v1275_v34, %v1273_v63  ;;  %v1210_v12 = vadd.f32 1.0, %v1868_v3 }
 0x24d   :  { %v1211_v54 = vadd.f32 1.0, %v1870_v39  ;;  %v1337_v52 = vmul.f32 %v1209_v50, %v825_v18 }
 0x24e   :  { %v1372_v23 = vpack.c.bf16 %v1276_v47, %v1274_v40  ;;  %v1872_v27 = vpop.eup %1871  ;;  %v1338_v31 = vmul.f32 %v1210_v12, %v826_v21 }
 0x24f   :  { %v1339_v15 = vmul.f32 %v1211_v54, %v827_v13  ;;  %v1212_v51 = vadd.f32 1.0, %v1872_v27 }
 0x250   :  { %1442 = vmatprep.subr.bf16.mxu0 %v1372_v23 }
 0x251   :  { %1443 = vmatpush1.bf16.msra.mxu0 %v1371_v0  ;;  %v1403_v1 = vpack.c.bf16 %v1339_v15, %v1337_v52  ;;  %v1340_v10 = vmul.f32 %v1212_v51, %v828_v60 }
 0x253   :  { %v1404_v49 = vpack.c.bf16 %v1340_v10, %v1338_v31 }
 0x254   :  { %1445 = vmatmul.mubr.bf16.vlgmr.msra.gmra.mrb[64].mxu0 %v1582_v61 }
 0x255   :  { %1483 = vmatprep.subr.bf16.mxu1 %v1404_v49 }
 0x256   :  { %1484 = vmatpush1.bf16.msra.mxu1 %v1403_v1 }
 0x259   :  { %1486 = vmatmul.mubr.bf16.vlgmr.msra.gmra.mrb[64].mxu1 %v1582_v61 }
 0x327   :  { %v1446_v32 = vpop.f32.mrb[64].mxu0 }
 0x328   :  { %v1448_v19 = vpop.f32.mrb[65].mxu0 }
 0x329   :  { %v1498_v8 = vcombine.low %v1446_v32, %v1448_v19  ;;  %v1504_v22 = vcombine.high %v1446_v32, %v1448_v19  ;;  %v1450_v38 = vpop.f32.mrb[66].mxu0 }
 0x32a   :  { %v1451_v25 = vpop.f32.mrb[67].mxu0 }
 0x32b   :  { %v1502_v37 = vmul.f32 %v1498_v8, %v3133_v53 }
 0x32c   :  { %v1487_v29 = vpop.f32.mrb[64].mxu1 }
 0x32d   :  { %v1508_v36 = vadd.f32 %v1504_v22, %v1502_v37  ;;  %v1489_v55 = vpop.f32.mrb[65].mxu1 }
 0x32e   :  { %v1499_v48 = vcombine.low %v1487_v29, %v1489_v55  ;;  %v1505_v41 = vcombine.high %v1487_v29, %v1489_v55  ;;  %v1491_v6 = vpop.f32.mrb[66].mxu1 }
 0x32f   :  { %1510 = vst [vmem:[#allocation2] sm:$0xff] %v1508_v36  ;;  %v1492_v45 = vpop.f32.mrb[67].mxu1 }
 0x330   :  { %v1503_v35 = vmul.f32 %v1499_v48, %v3134_v16 }
 0x332   :  { %v1509_v30 = vadd.f32 %v1505_v41, %v1503_v35 }
 0x334   :  { %1511 = vst [vmem:[#allocation2 + $0x8] sm:$0xff] %v1509_v30 }
 0x335   :  { %1884 = shalt.err (!%p1881_p4)
}
 0x336   :  { %s1885_s8 = scalar_lea.hbm %s3083_s3, 256 }
 0x337   :  { %p1886_p5 = scmp.ne.s32.totalorder %s3083_s3, %s1885_s8  ;;  %p1889_p6 = scmp.lt.u32.totalorder %s1885_s8, %s3083_s3 }
 0x339   :  { %p1891_p7 = pnand %p1889_p6, %p1886_p5 }
 0x33b   :  { %1894 = shalt.err (!%p1891_p7)
}
 0x33c   :  { %s1900_s13 = smov 128   ;;  %s1901_s14 = smov 8  }
 0x33d   :  { %1523 = dma.vmem_to_hbm [thread:$0]  %s1518_s30, 256, %s3083_s3, [#allocation3], %s1900_s13, %s1900_s13, %s1901_s14  }
 0x33e   :  { %1895 = dma.done.wait [#allocation3], 256  }
 0x33f   :  { %1896 = vsyncadd [#allocation3], 4294967040 }
 0x340   :  { %1531 = vsyncpa [#allocation3], 1 }

</bundles_post_ra>
